<compile_context>
chip_gen: v7x
topology: tpu7x:2x2x1
jax: 0.10.0
libtpu: 0.0.40
codegen_flags: <defaults>
</compile_context>

<pallas_src>
import jax
import jax.numpy as jnp
from jax.experimental import pallas as pl
from jax.experimental.pallas import tpu as pltpu

# ---- hyperparameters (mirror the PyTorch module) ----
NUM_NODE_FEATURES = 1
HIDDEN_CHANNELS = 16
OP_EMBED_DIM = 8
LSTM_HIDDEN = 16
NUM_OPERATIONS = 7          # embedding vocab = NUM_OPERATIONS + 1
BN_EPS = 1e-5
FC_PAD = 128                # lane-dense padding for the MLP head


def _gelu(v):
    # exact (erf) GELU, matches torch.nn.functional.gelu default
    return 0.5 * v * (1.0 + jax.lax.erf(v * jnp.float32(0.7071067811865476)))


def _make_kernel(T, B):
    H = HIDDEN_CHANNELS
    Hl = LSTM_HIDDEN

    def kernel(a_ref, x_ref, vecs_ref, gcnw_ref, emb_ref, wiht_ref, whht_ref,
               fcw_ref, fcb_ref, out_ref):
        a = a_ref[...]                 # [N, N]
        x0 = x_ref[...]                # [N, F]

        def bn_gelu(v, gamma, beta):
            # BatchNorm1d training-mode math; mean and E[x^2] in one pass.
            mu = jnp.mean(v, axis=0, keepdims=True)
            msq = jnp.mean(v * v, axis=0, keepdims=True)
            var = msq - mu * mu
            vhat = (v - mu) * jax.lax.rsqrt(var + BN_EPS)
            return _gelu(vhat * gamma[None, :] + beta[None, :])

        # ---- GCN layer 1 (F=1: X @ W1 is a broadcast multiply) ----
        w1row = vecs_ref[0]
        h = jnp.dot(a, x0 * w1row[None, :],
                    preferred_element_type=jnp.float32) + vecs_ref[1][None, :]
        h = bn_gelu(h, vecs_ref[2], vecs_ref[3])
        # ---- GCN layer 2 ----
        h = jnp.dot(a, jnp.dot(h, gcnw_ref[0], preferred_element_type=jnp.float32),
                    preferred_element_type=jnp.float32) + vecs_ref[4][None, :]
        h = bn_gelu(h, vecs_ref[5], vecs_ref[6])
        # ---- GCN layer 3 ----
        h = jnp.dot(a, jnp.dot(h, gcnw_ref[1], preferred_element_type=jnp.float32),
                    preferred_element_type=jnp.float32) + vecs_ref[7][None, :]
        h = bn_gelu(h, vecs_ref[8], vecs_ref[9])

        h = x0 + h                                   # residual (broadcast [N,1] + [N,H])
        g_emb = jnp.mean(h, axis=0, keepdims=True)   # [1, H]

        # ---- LSTM ----
        # Hoisted per-gate input projections over the whole sequence (off the
        # serial chain): [T*B, E] @ [E, H] per gate, fused bias added here once.
        emb2 = emb_ref[...]                          # [T*B, E]
        xp = [jnp.dot(emb2, wiht_ref[g], preferred_element_type=jnp.float32)
              + vecs_ref[10 + g][None, :] for g in range(4)]        # 4 x [T*B, H]
        whh_i = whht_ref[0]
        whh_f = whht_ref[1]
        whh_g = whht_ref[2]
        whh_o = whht_ref[3]

        h_t = jnp.zeros((B, Hl), jnp.float32)
        c_t = jnp.zeros((B, Hl), jnp.float32)
        for t in range(T):                           # static, fully unrolled recurrence
            lo = t * B
            gi = xp[0][lo:lo + B] + jnp.dot(h_t, whh_i, preferred_element_type=jnp.float32)
            gf = xp[1][lo:lo + B] + jnp.dot(h_t, whh_f, preferred_element_type=jnp.float32)
            gg = xp[2][lo:lo + B] + jnp.dot(h_t, whh_g, preferred_element_type=jnp.float32)
            go = xp[3][lo:lo + B] + jnp.dot(h_t, whh_o, preferred_element_type=jnp.float32)
            i_g = jax.nn.sigmoid(gi)
            f_g = jax.nn.sigmoid(gf)
            c_t = f_g * c_t + i_g * jnp.tanh(gg)
            h_t = jax.nn.sigmoid(go) * jnp.tanh(c_t)  # lstm_out[:, -1, :] after last t

        # ---- MLP head (concat-free; zero-padded 128-wide lane-dense activations) ----
        wf1 = fcw_ref[0]                              # [128,128], rows 0:H g-part, H:H+Hl lstm-part
        g_row = jnp.dot(g_emb, wf1[:H, :], preferred_element_type=jnp.float32)      # [1, 128]
        z = jnp.dot(h_t, wf1[H:H + Hl, :], preferred_element_type=jnp.float32)      # [B, 128]
        z = _gelu(z + g_row + fcb_ref[0][None, :])
        # TODO(synk): dropout(p=0.5) treated as inference-mode identity (no RNG mask applied).
        z = _gelu(jnp.dot(z, fcw_ref[1], preferred_element_type=jnp.float32) + fcb_ref[1][None, :])
        z = _gelu(jnp.dot(z, fcw_ref[2], preferred_element_type=jnp.float32) + fcb_ref[2][None, :])
        z = jnp.dot(z, fcw_ref[3], preferred_element_type=jnp.float32) + fcb_ref[3][None, :]
        out_ref[...] = z.astype(out_ref.dtype)        # [B, 128]; column 0 is the result

    return kernel


def init_params(key):
    ks = list(jax.random.split(key, 16))

    def linear(k, fan_in, fan_out):
        bound = 1.0 / jnp.sqrt(jnp.float32(fan_in))
        kw, kb = jax.random.split(k)
        w = jax.random.uniform(kw, (fan_in, fan_out), jnp.float32, -bound, bound)
        b = jax.random.uniform(kb, (fan_out,), jnp.float32, -bound, bound)
        return w, b

    p = {}
    # GCN layers (weight [in, out], bias [out]) + BatchNorm affine params
    p["w1"], p["b1"] = linear(ks[0], NUM_NODE_FEATURES, HIDDEN_CHANNELS)
    p["w2"], p["b2"] = linear(ks[1], HIDDEN_CHANNELS, HIDDEN_CHANNELS)
    p["w3"], p["b3"] = linear(ks[2], HIDDEN_CHANNELS, HIDDEN_CHANNELS)
    for i in (1, 2, 3):
        p[f"g{i}"] = jnp.ones((HIDDEN_CHANNELS,), jnp.float32)
        p[f"be{i}"] = jnp.zeros((HIDDEN_CHANNELS,), jnp.float32)
    # Embedding table
    p["emb_table"] = 0.1 * jax.random.normal(
        ks[3], (NUM_OPERATIONS + 1, OP_EMBED_DIM), jnp.float32)
    # LSTM (torch layout: weight_ih [4H, E], weight_hh [4H, H], biases [4H]; gate order i,f,g,o)
    lb = 1.0 / jnp.sqrt(jnp.float32(LSTM_HIDDEN))
    p["wih"] = jax.random.uniform(ks[4], (4 * LSTM_HIDDEN, OP_EMBED_DIM), jnp.float32, -lb, lb)
    p["whh"] = jax.random.uniform(ks[5], (4 * LSTM_HIDDEN, LSTM_HIDDEN), jnp.float32, -lb, lb)
    p["bih"] = jax.random.uniform(ks[6], (4 * LSTM_HIDDEN,), jnp.float32, -lb, lb)
    p["bhh"] = jax.random.uniform(ks[7], (4 * LSTM_HIDDEN,), jnp.float32, -lb, lb)
    # FC head
    p["wf1"], p["bf1"] = linear(ks[8], HIDDEN_CHANNELS + LSTM_HIDDEN, 128)
    p["wf2"], p["bf2"] = linear(ks[9], 128, 64)
    p["wf3"], p["bf3"] = linear(ks[10], 64, 32)
    p["wf4"], p["bf4"] = linear(ks[11], 32, 1)
    return p


def _pack_params(params):
    """Pack the many small parameters into a few VMEM-friendly slabs (wrapper-side, free)."""
    Hl = LSTM_HIDDEN
    fused_lstm_bias = params["bih"] + params["bhh"]                   # [4H]
    vecs = jnp.stack(
        [params["w1"][0],
         params["b1"], params["g1"], params["be1"],
         params["b2"], params["g2"], params["be2"],
         params["b3"], params["g3"], params["be3"]]
        + [fused_lstm_bias[g * Hl:(g + 1) * Hl] for g in range(4)],
        axis=0).astype(jnp.float32)                                   # [14, 16]

    gcnw = jnp.stack([params["w2"], params["w3"]], axis=0).astype(jnp.float32)   # [2,16,16]

    # Pre-split + pre-transposed LSTM weights (gate order i,f,g,o).
    wiht = jnp.stack([params["wih"][g * Hl:(g + 1) * Hl, :].T for g in range(4)],
                     axis=0).astype(jnp.float32)                      # [4, E, H]
    whht = jnp.stack([params["whh"][g * Hl:(g + 1) * Hl, :].T for g in range(4)],
                     axis=0).astype(jnp.float32)                      # [4, H, H]

    def pad_w(w):
        return jnp.zeros((FC_PAD, FC_PAD), jnp.float32).at[:w.shape[0], :w.shape[1]].set(w)

    def pad_b(b):
        return jnp.zeros((FC_PAD,), jnp.float32).at[:b.shape[0]].set(b)

    fcw = jnp.stack([pad_w(params["wf1"]), pad_w(params["wf2"]),
                     pad_w(params["wf3"]), pad_w(params["wf4"])], axis=0)        # [4,128,128]
    fcb = jnp.stack([pad_b(params["bf1"]), pad_b(params["bf2"]),
                     pad_b(params["bf3"]), pad_b(params["bf4"])], axis=0)        # [4,128]
    return vecs, gcnw, wiht, whht, fcw, fcb


def gcn_lstm_forward(params, x, edge_index, operations):
    """x: [N, F] float32, edge_index: [2, E] int32 (src; dst), operations: [B, T] int32."""
    N = x.shape[0]
    src, dst = edge_index[0], edge_index[1]

    # dense equivalent of PyG gcn_norm: A[i, j] = edges j->i, add self loops, sym-normalize
    adj = jnp.zeros((N, N), jnp.float32).at[dst, src].add(1.0)
    adj = adj.at[jnp.arange(N), jnp.arange(N)].add(1.0)
    deg = jnp.sum(adj, axis=1)
    dis = jnp.where(deg > 0, jax.lax.rsqrt(deg), 0.0)
    a_hat = dis[:, None] * adj * dis[None, :]

    # embedding gather (glue), time-major then flattened to [T*B, E] (row t*B+b)
    B, T = operations.shape
    emb = params["emb_table"][operations]                                   # [B, T, E]
    emb2d = jnp.transpose(emb, (1, 0, 2)).reshape(T * B, OP_EMBED_DIM)
    emb2d = emb2d.astype(jnp.float32)

    vecs, gcnw, wiht, whht, fcw, fcb = _pack_params(params)

    inputs = (a_hat, x.astype(jnp.float32), vecs, gcnw, emb2d, wiht, whht, fcw, fcb)
    vmem = pl.BlockSpec(memory_space=pltpu.MemorySpace.VMEM)
    out = pl.pallas_call(
        _make_kernel(T=T, B=B),
        out_shape=jax.ShapeDtypeStruct((B, FC_PAD), jnp.float32),   # lane-dense output slab
        in_specs=[vmem] * len(inputs),
        out_specs=vmem,
    )(*inputs)
    return out[:, 0]   # out.squeeze()


if __name__ == "__main__":
    key = jax.random.PRNGKey(0)
    k_param, k_x, k_ops = jax.random.split(key, 3)

    N = 16                # graph nodes
    B = 2                 # operation sequences (batch)
    T = 8                 # sequence length

    params = init_params(k_param)

    # node features [N, 1]
    x = jax.random.normal(k_x, (N, NUM_NODE_FEATURES), jnp.float32)

    # deterministic ring graph, both directions: edge_index [2, 2N]
    idx = jnp.arange(N, dtype=jnp.int32)
    src = jnp.concatenate([idx, (idx + 1) % N])
    dst = jnp.concatenate([(idx + 1) % N, idx])
    edge_index = jnp.stack([src, dst], axis=0)

    # operation token ids in [0, NUM_OPERATIONS]
    operations = jax.random.randint(k_ops, (B, T), 0, NUM_OPERATIONS + 1, jnp.int32)

    out = gcn_lstm_forward(params, x, edge_index, operations)
    out = jax.block_until_ready(out)
    assert out.shape == (B,)
    print("KERNEL_OK")
</pallas_src>

<mosaic_0001>
module attributes {stable_mosaic.version = 11 : i64} {
  func.func @kernel(%arg0: memref<16x16xf32, #tpu.memory_space<vmem>>, %arg1: memref<16x1xf32, #tpu.memory_space<vmem>>, %arg2: memref<14x16xf32, #tpu.memory_space<vmem>>, %arg3: memref<2x16x16xf32, #tpu.memory_space<vmem>>, %arg4: memref<16x8xf32, #tpu.memory_space<vmem>>, %arg5: memref<4x8x16xf32, #tpu.memory_space<vmem>>, %arg6: memref<4x16x16xf32, #tpu.memory_space<vmem>>, %arg7: memref<4x128x128xf32, #tpu.memory_space<vmem>>, %arg8: memref<4x128xf32, #tpu.memory_space<vmem>>, %arg9: memref<2x128xf32, #tpu.memory_space<vmem>>) attributes {dimension_semantics = [], scalar_prefetch = 0 : i64, scratch_operands = 0 : i64, tpu.core_type = #tpu.core_type<tc>} {
    %c0 = arith.constant 0 : index
    %c0_0 = arith.constant 0 : index
    %0 = vector.load %arg0[%c0, %c0_0] : memref<16x16xf32, #tpu.memory_space<vmem>>, vector<16x16xf32>
    %c0_1 = arith.constant 0 : index
    %c0_2 = arith.constant 0 : index
    %1 = vector.load %arg1[%c0_1, %c0_2] : memref<16x1xf32, #tpu.memory_space<vmem>>, vector<16x1xf32>
    %c0_3 = arith.constant 0 : index
    %c0_4 = arith.constant 0 : index
    %2 = vector.load %arg2[%c0_3, %c0_4] : memref<14x16xf32, #tpu.memory_space<vmem>>, vector<1x16xf32>
    %3 = vector.shape_cast %2 : vector<1x16xf32> to vector<16xf32>
    %4 = vector.shape_cast %3 : vector<16xf32> to vector<1x16xf32>
    %5 = vector.broadcast %1 : vector<16x1xf32> to vector<16x16xf32>
    %6 = vector.broadcast %4 : vector<1x16xf32> to vector<16x16xf32>
    %7 = arith.mulf %5, %6 : vector<16x16xf32>
    %cst = arith.constant dense<0.000000e+00> : vector<16x16xf32>
    %8 = tpu.matmul %0, %7, %cst {dimension_numbers = #tpu.dot_dimension_numbers<[1], [0], [0], [1], [0, 0, 1, 1], [], []>} : vector<16x16xf32>, vector<16x16xf32>, vector<16x16xf32> -> vector<16x16xf32>
    %c1 = arith.constant 1 : index
    %c0_5 = arith.constant 0 : index
    %9 = vector.load %arg2[%c1, %c0_5] : memref<14x16xf32, #tpu.memory_space<vmem>>, vector<1x16xf32>
    %10 = vector.shape_cast %9 : vector<1x16xf32> to vector<16xf32>
    %11 = vector.shape_cast %10 : vector<16xf32> to vector<1x16xf32>
    %12 = vector.broadcast %11 : vector<1x16xf32> to vector<16x16xf32>
    %13 = arith.addf %8, %12 : vector<16x16xf32>
    %c2 = arith.constant 2 : index
    %c0_6 = arith.constant 0 : index
    %14 = vector.load %arg2[%c2, %c0_6] : memref<14x16xf32, #tpu.memory_space<vmem>>, vector<1x16xf32>
    %15 = vector.shape_cast %14 : vector<1x16xf32> to vector<16xf32>
    %c3 = arith.constant 3 : index
    %c0_7 = arith.constant 0 : index
    %16 = vector.load %arg2[%c3, %c0_7] : memref<14x16xf32, #tpu.memory_space<vmem>>, vector<1x16xf32>
    %17 = vector.shape_cast %16 : vector<1x16xf32> to vector<16xf32>
    %cst_8 = arith.constant dense<0.000000e+00> : vector<16xf32>
    %18 = vector.multi_reduction <add>, %13, %cst_8 [0] : vector<16x16xf32> to vector<16xf32>
    %19 = vector.shape_cast %18 : vector<16xf32> to vector<1x16xf32>
    %cst_9 = arith.constant 1.600000e+01 : f32
    %20 = vector.broadcast %cst_9 : f32 to vector<1x16xf32>
    %21 = arith.divf %19, %20 : vector<1x16xf32>
    %22 = arith.mulf %13, %13 : vector<16x16xf32>
    %cst_10 = arith.constant dense<0.000000e+00> : vector<16xf32>
    %23 = vector.multi_reduction <add>, %22, %cst_10 [0] : vector<16x16xf32> to vector<16xf32>
    %24 = vector.shape_cast %23 : vector<16xf32> to vector<1x16xf32>
    %cst_11 = arith.constant 1.600000e+01 : f32
    %25 = vector.broadcast %cst_11 : f32 to vector<1x16xf32>
    %26 = arith.divf %24, %25 : vector<1x16xf32>
    %27 = arith.mulf %21, %21 : vector<1x16xf32>
    %28 = arith.subf %26, %27 : vector<1x16xf32>
    %29 = vector.broadcast %21 : vector<1x16xf32> to vector<16x16xf32>
    %30 = arith.subf %13, %29 : vector<16x16xf32>
    %cst_12 = arith.constant 9.99999974E-6 : f32
    %31 = vector.broadcast %cst_12 : f32 to vector<1x16xf32>
    %32 = arith.addf %28, %31 : vector<1x16xf32>
    %33 = math.rsqrt %32 : vector<1x16xf32>
    %34 = vector.broadcast %33 : vector<1x16xf32> to vector<16x16xf32>
    %35 = arith.mulf %30, %34 : vector<16x16xf32>
    %36 = vector.shape_cast %15 : vector<16xf32> to vector<1x16xf32>
    %37 = vector.broadcast %36 : vector<1x16xf32> to vector<16x16xf32>
    %38 = arith.mulf %35, %37 : vector<16x16xf32>
    %39 = vector.shape_cast %17 : vector<16xf32> to vector<1x16xf32>
    %40 = vector.broadcast %39 : vector<1x16xf32> to vector<16x16xf32>
    %41 = arith.addf %38, %40 : vector<16x16xf32>
    %cst_13 = arith.constant 5.000000e-01 : f32
    %42 = vector.broadcast %cst_13 : f32 to vector<16x16xf32>
    %43 = arith.mulf %42, %41 : vector<16x16xf32>
    %cst_14 = arith.constant 0.707106769 : f32
    %44 = vector.broadcast %cst_14 : f32 to vector<16x16xf32>
    %45 = arith.mulf %41, %44 : vector<16x16xf32>
    %46 = math.erf %45 : vector<16x16xf32>
    %cst_15 = arith.constant 1.000000e+00 : f32
    %47 = vector.broadcast %cst_15 : f32 to vector<16x16xf32>
    %48 = arith.addf %47, %46 : vector<16x16xf32>
    %49 = arith.mulf %43, %48 : vector<16x16xf32>
    %c0_16 = arith.constant 0 : index
    %c0_17 = arith.constant 0 : index
    %c0_18 = arith.constant 0 : index
    %50 = vector.load %arg3[%c0_16, %c0_17, %c0_18] : memref<2x16x16xf32, #tpu.memory_space<vmem>>, vector<1x16x16xf32>
    %51 = vector.shape_cast %50 : vector<1x16x16xf32> to vector<16x16xf32>
    %cst_19 = arith.constant dense<0.000000e+00> : vector<16x16xf32>
    %52 = tpu.matmul %49, %51, %cst_19 {dimension_numbers = #tpu.dot_dimension_numbers<[1], [0], [0], [1], [0, 0, 1, 1], [], []>} : vector<16x16xf32>, vector<16x16xf32>, vector<16x16xf32> -> vector<16x16xf32>
    %cst_20 = arith.constant dense<0.000000e+00> : vector<16x16xf32>
    %53 = tpu.matmul %0, %52, %cst_20 {dimension_numbers = #tpu.dot_dimension_numbers<[1], [0], [0], [1], [0, 0, 1, 1], [], []>} : vector<16x16xf32>, vector<16x16xf32>, vector<16x16xf32> -> vector<16x16xf32>
    %c4 = arith.constant 4 : index
    %c0_21 = arith.constant 0 : index
    %54 = vector.load %arg2[%c4, %c0_21] : memref<14x16xf32, #tpu.memory_space<vmem>>, vector<1x16xf32>
    %55 = vector.shape_cast %54 : vector<1x16xf32> to vector<16xf32>
    %56 = vector.shape_cast %55 : vector<16xf32> to vector<1x16xf32>
    %57 = vector.broadcast %56 : vector<1x16xf32> to vector<16x16xf32>
    %58 = arith.addf %53, %57 : vector<16x16xf32>
    %c5 = arith.constant 5 : index
    %c0_22 = arith.constant 0 : index
    %59 = vector.load %arg2[%c5, %c0_22] : memref<14x16xf32, #tpu.memory_space<vmem>>, vector<1x16xf32>
    %60 = vector.shape_cast %59 : vector<1x16xf32> to vector<16xf32>
    %c6 = arith.constant 6 : index
    %c0_23 = arith.constant 0 : index
    %61 = vector.load %arg2[%c6, %c0_23] : memref<14x16xf32, #tpu.memory_space<vmem>>, vector<1x16xf32>
    %62 = vector.shape_cast %61 : vector<1x16xf32> to vector<16xf32>
    %cst_24 = arith.constant dense<0.000000e+00> : vector<16xf32>
    %63 = vector.multi_reduction <add>, %58, %cst_24 [0] : vector<16x16xf32> to vector<16xf32>
    %64 = vector.shape_cast %63 : vector<16xf32> to vector<1x16xf32>
    %cst_25 = arith.constant 1.600000e+01 : f32
    %65 = vector.broadcast %cst_25 : f32 to vector<1x16xf32>
    %66 = arith.divf %64, %65 : vector<1x16xf32>
    %67 = arith.mulf %58, %58 : vector<16x16xf32>
    %cst_26 = arith.constant dense<0.000000e+00> : vector<16xf32>
    %68 = vector.multi_reduction <add>, %67, %cst_26 [0] : vector<16x16xf32> to vector<16xf32>
    %69 = vector.shape_cast %68 : vector<16xf32> to vector<1x16xf32>
    %cst_27 = arith.constant 1.600000e+01 : f32
    %70 = vector.broadcast %cst_27 : f32 to vector<1x16xf32>
    %71 = arith.divf %69, %70 : vector<1x16xf32>
    %72 = arith.mulf %66, %66 : vector<1x16xf32>
    %73 = arith.subf %71, %72 : vector<1x16xf32>
    %74 = vector.broadcast %66 : vector<1x16xf32> to vector<16x16xf32>
    %75 = arith.subf %58, %74 : vector<16x16xf32>
    %cst_28 = arith.constant 9.99999974E-6 : f32
    %76 = vector.broadcast %cst_28 : f32 to vector<1x16xf32>
    %77 = arith.addf %73, %76 : vector<1x16xf32>
    %78 = math.rsqrt %77 : vector<1x16xf32>
    %79 = vector.broadcast %78 : vector<1x16xf32> to vector<16x16xf32>
    %80 = arith.mulf %75, %79 : vector<16x16xf32>
    %81 = vector.shape_cast %60 : vector<16xf32> to vector<1x16xf32>
    %82 = vector.broadcast %81 : vector<1x16xf32> to vector<16x16xf32>
    %83 = arith.mulf %80, %82 : vector<16x16xf32>
    %84 = vector.shape_cast %62 : vector<16xf32> to vector<1x16xf32>
    %85 = vector.broadcast %84 : vector<1x16xf32> to vector<16x16xf32>
    %86 = arith.addf %83, %85 : vector<16x16xf32>
    %cst_29 = arith.constant 5.000000e-01 : f32
    %87 = vector.broadcast %cst_29 : f32 to vector<16x16xf32>
    %88 = arith.mulf %87, %86 : vector<16x16xf32>
    %cst_30 = arith.constant 0.707106769 : f32
    %89 = vector.broadcast %cst_30 : f32 to vector<16x16xf32>
    %90 = arith.mulf %86, %89 : vector<16x16xf32>
    %91 = math.erf %90 : vector<16x16xf32>
    %cst_31 = arith.constant 1.000000e+00 : f32
    %92 = vector.broadcast %cst_31 : f32 to vector<16x16xf32>
    %93 = arith.addf %92, %91 : vector<16x16xf32>
    %94 = arith.mulf %88, %93 : vector<16x16xf32>
    %c1_32 = arith.constant 1 : index
    %c0_33 = arith.constant 0 : index
    %c0_34 = arith.constant 0 : index
    %95 = vector.load %arg3[%c1_32, %c0_33, %c0_34] : memref<2x16x16xf32, #tpu.memory_space<vmem>>, vector<1x16x16xf32>
    %96 = vector.shape_cast %95 : vector<1x16x16xf32> to vector<16x16xf32>
    %cst_35 = arith.constant dense<0.000000e+00> : vector<16x16xf32>
    %97 = tpu.matmul %94, %96, %cst_35 {dimension_numbers = #tpu.dot_dimension_numbers<[1], [0], [0], [1], [0, 0, 1, 1], [], []>} : vector<16x16xf32>, vector<16x16xf32>, vector<16x16xf32> -> vector<16x16xf32>
    %cst_36 = arith.constant dense<0.000000e+00> : vector<16x16xf32>
    %98 = tpu.matmul %0, %97, %cst_36 {dimension_numbers = #tpu.dot_dimension_numbers<[1], [0], [0], [1], [0, 0, 1, 1], [], []>} : vector<16x16xf32>, vector<16x16xf32>, vector<16x16xf32> -> vector<16x16xf32>
    %c7 = arith.constant 7 : index
    %c0_37 = arith.constant 0 : index
    %99 = vector.load %arg2[%c7, %c0_37] : memref<14x16xf32, #tpu.memory_space<vmem>>, vector<1x16xf32>
    %100 = vector.shape_cast %99 : vector<1x16xf32> to vector<16xf32>
    %101 = vector.shape_cast %100 : vector<16xf32> to vector<1x16xf32>
    %102 = vector.broadcast %101 : vector<1x16xf32> to vector<16x16xf32>
    %103 = arith.addf %98, %102 : vector<16x16xf32>
    %c8 = arith.constant 8 : index
    %c0_38 = arith.constant 0 : index
    %104 = vector.load %arg2[%c8, %c0_38] : memref<14x16xf32, #tpu.memory_space<vmem>>, vector<1x16xf32>
    %105 = vector.shape_cast %104 : vector<1x16xf32> to vector<16xf32>
    %c9 = arith.constant 9 : index
    %c0_39 = arith.constant 0 : index
    %106 = vector.load %arg2[%c9, %c0_39] : memref<14x16xf32, #tpu.memory_space<vmem>>, vector<1x16xf32>
    %107 = vector.shape_cast %106 : vector<1x16xf32> to vector<16xf32>
    %cst_40 = arith.constant dense<0.000000e+00> : vector<16xf32>
    %108 = vector.multi_reduction <add>, %103, %cst_40 [0] : vector<16x16xf32> to vector<16xf32>
    %109 = vector.shape_cast %108 : vector<16xf32> to vector<1x16xf32>
    %cst_41 = arith.constant 1.600000e+01 : f32
    %110 = vector.broadcast %cst_41 : f32 to vector<1x16xf32>
    %111 = arith.divf %109, %110 : vector<1x16xf32>
    %112 = arith.mulf %103, %103 : vector<16x16xf32>
    %cst_42 = arith.constant dense<0.000000e+00> : vector<16xf32>
    %113 = vector.multi_reduction <add>, %112, %cst_42 [0] : vector<16x16xf32> to vector<16xf32>
    %114 = vector.shape_cast %113 : vector<16xf32> to vector<1x16xf32>
    %cst_43 = arith.constant 1.600000e+01 : f32
    %115 = vector.broadcast %cst_43 : f32 to vector<1x16xf32>
    %116 = arith.divf %114, %115 : vector<1x16xf32>
    %117 = arith.mulf %111, %111 : vector<1x16xf32>
    %118 = arith.subf %116, %117 : vector<1x16xf32>
    %119 = vector.broadcast %111 : vector<1x16xf32> to vector<16x16xf32>
    %120 = arith.subf %103, %119 : vector<16x16xf32>
    %cst_44 = arith.constant 9.99999974E-6 : f32
    %121 = vector.broadcast %cst_44 : f32 to vector<1x16xf32>
    %122 = arith.addf %118, %121 : vector<1x16xf32>
    %123 = math.rsqrt %122 : vector<1x16xf32>
    %124 = vector.broadcast %123 : vector<1x16xf32> to vector<16x16xf32>
    %125 = arith.mulf %120, %124 : vector<16x16xf32>
    %126 = vector.shape_cast %105 : vector<16xf32> to vector<1x16xf32>
    %127 = vector.broadcast %126 : vector<1x16xf32> to vector<16x16xf32>
    %128 = arith.mulf %125, %127 : vector<16x16xf32>
    %129 = vector.shape_cast %107 : vector<16xf32> to vector<1x16xf32>
    %130 = vector.broadcast %129 : vector<1x16xf32> to vector<16x16xf32>
    %131 = arith.addf %128, %130 : vector<16x16xf32>
    %cst_45 = arith.constant 5.000000e-01 : f32
    %132 = vector.broadcast %cst_45 : f32 to vector<16x16xf32>
    %133 = arith.mulf %132, %131 : vector<16x16xf32>
    %cst_46 = arith.constant 0.707106769 : f32
    %134 = vector.broadcast %cst_46 : f32 to vector<16x16xf32>
    %135 = arith.mulf %131, %134 : vector<16x16xf32>
    %136 = math.erf %135 : vector<16x16xf32>
    %cst_47 = arith.constant 1.000000e+00 : f32
    %137 = vector.broadcast %cst_47 : f32 to vector<16x16xf32>
    %138 = arith.addf %137, %136 : vector<16x16xf32>
    %139 = arith.mulf %133, %138 : vector<16x16xf32>
    %140 = vector.broadcast %1 : vector<16x1xf32> to vector<16x16xf32>
    %141 = arith.addf %140, %139 : vector<16x16xf32>
    %cst_48 = arith.constant dense<0.000000e+00> : vector<16xf32>
    %142 = vector.multi_reduction <add>, %141, %cst_48 [0] : vector<16x16xf32> to vector<16xf32>
    %143 = vector.shape_cast %142 : vector<16xf32> to vector<1x16xf32>
    %cst_49 = arith.constant 1.600000e+01 : f32
    %144 = vector.broadcast %cst_49 : f32 to vector<1x16xf32>
    %145 = arith.divf %143, %144 : vector<1x16xf32>
    %c0_50 = arith.constant 0 : index
    %c0_51 = arith.constant 0 : index
    %146 = vector.load %arg4[%c0_50, %c0_51] : memref<16x8xf32, #tpu.memory_space<vmem>>, vector<16x8xf32>
    %c0_52 = arith.constant 0 : index
    %c0_53 = arith.constant 0 : index
    %c0_54 = arith.constant 0 : index
    %147 = vector.load %arg5[%c0_52, %c0_53, %c0_54] : memref<4x8x16xf32, #tpu.memory_space<vmem>>, vector<1x8x16xf32>
    %148 = vector.shape_cast %147 : vector<1x8x16xf32> to vector<8x16xf32>
    %cst_55 = arith.constant dense<0.000000e+00> : vector<16x16xf32>
    %149 = tpu.matmul %146, %148, %cst_55 {dimension_numbers = #tpu.dot_dimension_numbers<[1], [0], [0], [1], [0, 0, 1, 1], [], []>} : vector<16x8xf32>, vector<8x16xf32>, vector<16x16xf32> -> vector<16x16xf32>
    %c10 = arith.constant 10 : index
    %c0_56 = arith.constant 0 : index
    %150 = vector.load %arg2[%c10, %c0_56] : memref<14x16xf32, #tpu.memory_space<vmem>>, vector<1x16xf32>
    %151 = vector.shape_cast %150 : vector<1x16xf32> to vector<16xf32>
    %152 = vector.shape_cast %151 : vector<16xf32> to vector<1x16xf32>
    %153 = vector.broadcast %152 : vector<1x16xf32> to vector<16x16xf32>
    %154 = arith.addf %149, %153 : vector<16x16xf32>
    %c1_57 = arith.constant 1 : index
    %c0_58 = arith.constant 0 : index
    %c0_59 = arith.constant 0 : index
    %155 = vector.load %arg5[%c1_57, %c0_58, %c0_59] : memref<4x8x16xf32, #tpu.memory_space<vmem>>, vector<1x8x16xf32>
    %156 = vector.shape_cast %155 : vector<1x8x16xf32> to vector<8x16xf32>
    %cst_60 = arith.constant dense<0.000000e+00> : vector<16x16xf32>
    %157 = tpu.matmul %146, %156, %cst_60 {dimension_numbers = #tpu.dot_dimension_numbers<[1], [0], [0], [1], [0, 0, 1, 1], [], []>} : vector<16x8xf32>, vector<8x16xf32>, vector<16x16xf32> -> vector<16x16xf32>
    %c11 = arith.constant 11 : index
    %c0_61 = arith.constant 0 : index
    %158 = vector.load %arg2[%c11, %c0_61] : memref<14x16xf32, #tpu.memory_space<vmem>>, vector<1x16xf32>
    %159 = vector.shape_cast %158 : vector<1x16xf32> to vector<16xf32>
    %160 = vector.shape_cast %159 : vector<16xf32> to vector<1x16xf32>
    %161 = vector.broadcast %160 : vector<1x16xf32> to vector<16x16xf32>
    %162 = arith.addf %157, %161 : vector<16x16xf32>
    %c2_62 = arith.constant 2 : index
    %c0_63 = arith.constant 0 : index
    %c0_64 = arith.constant 0 : index
    %163 = vector.load %arg5[%c2_62, %c0_63, %c0_64] : memref<4x8x16xf32, #tpu.memory_space<vmem>>, vector<1x8x16xf32>
    %164 = vector.shape_cast %163 : vector<1x8x16xf32> to vector<8x16xf32>
    %cst_65 = arith.constant dense<0.000000e+00> : vector<16x16xf32>
    %165 = tpu.matmul %146, %164, %cst_65 {dimension_numbers = #tpu.dot_dimension_numbers<[1], [0], [0], [1], [0, 0, 1, 1], [], []>} : vector<16x8xf32>, vector<8x16xf32>, vector<16x16xf32> -> vector<16x16xf32>
    %c12 = arith.constant 12 : index
    %c0_66 = arith.constant 0 : index
    %166 = vector.load %arg2[%c12, %c0_66] : memref<14x16xf32, #tpu.memory_space<vmem>>, vector<1x16xf32>
    %167 = vector.shape_cast %166 : vector<1x16xf32> to vector<16xf32>
    %168 = vector.shape_cast %167 : vector<16xf32> to vector<1x16xf32>
    %169 = vector.broadcast %168 : vector<1x16xf32> to vector<16x16xf32>
    %170 = arith.addf %165, %169 : vector<16x16xf32>
    %c3_67 = arith.constant 3 : index
    %c0_68 = arith.constant 0 : index
    %c0_69 = arith.constant 0 : index
    %171 = vector.load %arg5[%c3_67, %c0_68, %c0_69] : memref<4x8x16xf32, #tpu.memory_space<vmem>>, vector<1x8x16xf32>
    %172 = vector.shape_cast %171 : vector<1x8x16xf32> to vector<8x16xf32>
    %cst_70 = arith.constant dense<0.000000e+00> : vector<16x16xf32>
    %173 = tpu.matmul %146, %172, %cst_70 {dimension_numbers = #tpu.dot_dimension_numbers<[1], [0], [0], [1], [0, 0, 1, 1], [], []>} : vector<16x8xf32>, vector<8x16xf32>, vector<16x16xf32> -> vector<16x16xf32>
    %c13 = arith.constant 13 : index
    %c0_71 = arith.constant 0 : index
    %174 = vector.load %arg2[%c13, %c0_71] : memref<14x16xf32, #tpu.memory_space<vmem>>, vector<1x16xf32>
    %175 = vector.shape_cast %174 : vector<1x16xf32> to vector<16xf32>
    %176 = vector.shape_cast %175 : vector<16xf32> to vector<1x16xf32>
    %177 = vector.broadcast %176 : vector<1x16xf32> to vector<16x16xf32>
    %178 = arith.addf %173, %177 : vector<16x16xf32>
    %c0_72 = arith.constant 0 : index
    %c0_73 = arith.constant 0 : index
    %c0_74 = arith.constant 0 : index
    %179 = vector.load %arg6[%c0_72, %c0_73, %c0_74] : memref<4x16x16xf32, #tpu.memory_space<vmem>>, vector<1x16x16xf32>
    %180 = vector.shape_cast %179 : vector<1x16x16xf32> to vector<16x16xf32>
    %c1_75 = arith.constant 1 : index
    %c0_76 = arith.constant 0 : index
    %c0_77 = arith.constant 0 : index
    %181 = vector.load %arg6[%c1_75, %c0_76, %c0_77] : memref<4x16x16xf32, #tpu.memory_space<vmem>>, vector<1x16x16xf32>
    %182 = vector.shape_cast %181 : vector<1x16x16xf32> to vector<16x16xf32>
    %c2_78 = arith.constant 2 : index
    %c0_79 = arith.constant 0 : index
    %c0_80 = arith.constant 0 : index
    %183 = vector.load %arg6[%c2_78, %c0_79, %c0_80] : memref<4x16x16xf32, #tpu.memory_space<vmem>>, vector<1x16x16xf32>
    %184 = vector.shape_cast %183 : vector<1x16x16xf32> to vector<16x16xf32>
    %c3_81 = arith.constant 3 : index
    %c0_82 = arith.constant 0 : index
    %c0_83 = arith.constant 0 : index
    %185 = vector.load %arg6[%c3_81, %c0_82, %c0_83] : memref<4x16x16xf32, #tpu.memory_space<vmem>>, vector<1x16x16xf32>
    %186 = vector.shape_cast %185 : vector<1x16x16xf32> to vector<16x16xf32>
    %cst_84 = arith.constant 0.000000e+00 : f32
    %187 = vector.broadcast %cst_84 : f32 to vector<2x16xf32>
    %cst_85 = arith.constant 0.000000e+00 : f32
    %188 = vector.broadcast %cst_85 : f32 to vector<2x16xf32>
    %189 = vector.extract_strided_slice %154 {offsets = [0, 0], sizes = [2, 16], strides = [1, 1]} : vector<16x16xf32> to vector<2x16xf32>
    %cst_86 = arith.constant dense<0.000000e+00> : vector<2x16xf32>
    %190 = tpu.matmul %187, %180, %cst_86 {dimension_numbers = #tpu.dot_dimension_numbers<[1], [0], [0], [1], [0, 0, 1, 1], [], []>} : vector<2x16xf32>, vector<16x16xf32>, vector<2x16xf32> -> vector<2x16xf32>
    %191 = arith.addf %189, %190 : vector<2x16xf32>
    %192 = vector.extract_strided_slice %162 {offsets = [0, 0], sizes = [2, 16], strides = [1, 1]} : vector<16x16xf32> to vector<2x16xf32>
    %cst_87 = arith.constant dense<0.000000e+00> : vector<2x16xf32>
    %193 = tpu.matmul %187, %182, %cst_87 {dimension_numbers = #tpu.dot_dimension_numbers<[1], [0], [0], [1], [0, 0, 1, 1], [], []>} : vector<2x16xf32>, vector<16x16xf32>, vector<2x16xf32> -> vector<2x16xf32>
    %194 = arith.addf %192, %193 : vector<2x16xf32>
    %195 = vector.extract_strided_slice %170 {offsets = [0, 0], sizes = [2, 16], strides = [1, 1]} : vector<16x16xf32> to vector<2x16xf32>
    %cst_88 = arith.constant dense<0.000000e+00> : vector<2x16xf32>
    %196 = tpu.matmul %187, %184, %cst_88 {dimension_numbers = #tpu.dot_dimension_numbers<[1], [0], [0], [1], [0, 0, 1, 1], [], []>} : vector<2x16xf32>, vector<16x16xf32>, vector<2x16xf32> -> vector<2x16xf32>
    %197 = arith.addf %195, %196 : vector<2x16xf32>
    %198 = vector.extract_strided_slice %178 {offsets = [0, 0], sizes = [2, 16], strides = [1, 1]} : vector<16x16xf32> to vector<2x16xf32>
    %cst_89 = arith.constant dense<0.000000e+00> : vector<2x16xf32>
    %199 = tpu.matmul %187, %186, %cst_89 {dimension_numbers = #tpu.dot_dimension_numbers<[1], [0], [0], [1], [0, 0, 1, 1], [], []>} : vector<2x16xf32>, vector<16x16xf32>, vector<2x16xf32> -> vector<2x16xf32>
    %200 = arith.addf %198, %199 : vector<2x16xf32>
    %201 = arith.negf %191 : vector<2x16xf32>
    %202 = math.exp %201 : vector<2x16xf32>
    %cst_90 = arith.constant 1.000000e+00 : f32
    %203 = vector.broadcast %cst_90 : f32 to vector<2x16xf32>
    %204 = arith.addf %203, %202 : vector<2x16xf32>
    %205 = arith.divf %203, %204 : vector<2x16xf32>
    %206 = arith.negf %194 : vector<2x16xf32>
    %207 = math.exp %206 : vector<2x16xf32>
    %cst_91 = arith.constant 1.000000e+00 : f32
    %208 = vector.broadcast %cst_91 : f32 to vector<2x16xf32>
    %209 = arith.addf %208, %207 : vector<2x16xf32>
    %210 = arith.divf %208, %209 : vector<2x16xf32>
    %211 = arith.mulf %210, %188 : vector<2x16xf32>
    %212 = math.tanh %197 : vector<2x16xf32>
    %213 = arith.mulf %205, %212 : vector<2x16xf32>
    %214 = arith.addf %211, %213 : vector<2x16xf32>
    %215 = arith.negf %200 : vector<2x16xf32>
    %216 = math.exp %215 : vector<2x16xf32>
    %cst_92 = arith.constant 1.000000e+00 : f32
    %217 = vector.broadcast %cst_92 : f32 to vector<2x16xf32>
    %218 = arith.addf %217, %216 : vector<2x16xf32>
    %219 = arith.divf %217, %218 : vector<2x16xf32>
    %220 = math.tanh %214 : vector<2x16xf32>
    %221 = arith.mulf %219, %220 : vector<2x16xf32>
    %222 = vector.extract_strided_slice %154 {offsets = [2, 0], sizes = [2, 16], strides = [1, 1]} : vector<16x16xf32> to vector<2x16xf32>
    %cst_93 = arith.constant dense<0.000000e+00> : vector<2x16xf32>
    %223 = tpu.matmul %221, %180, %cst_93 {dimension_numbers = #tpu.dot_dimension_numbers<[1], [0], [0], [1], [0, 0, 1, 1], [], []>} : vector<2x16xf32>, vector<16x16xf32>, vector<2x16xf32> -> vector<2x16xf32>
    %224 = arith.addf %222, %223 : vector<2x16xf32>
    %225 = vector.extract_strided_slice %162 {offsets = [2, 0], sizes = [2, 16], strides = [1, 1]} : vector<16x16xf32> to vector<2x16xf32>
    %cst_94 = arith.constant dense<0.000000e+00> : vector<2x16xf32>
    %226 = tpu.matmul %221, %182, %cst_94 {dimension_numbers = #tpu.dot_dimension_numbers<[1], [0], [0], [1], [0, 0, 1, 1], [], []>} : vector<2x16xf32>, vector<16x16xf32>, vector<2x16xf32> -> vector<2x16xf32>
    %227 = arith.addf %225, %226 : vector<2x16xf32>
    %228 = vector.extract_strided_slice %170 {offsets = [2, 0], sizes = [2, 16], strides = [1, 1]} : vector<16x16xf32> to vector<2x16xf32>
    %cst_95 = arith.constant dense<0.000000e+00> : vector<2x16xf32>
    %229 = tpu.matmul %221, %184, %cst_95 {dimension_numbers = #tpu.dot_dimension_numbers<[1], [0], [0], [1], [0, 0, 1, 1], [], []>} : vector<2x16xf32>, vector<16x16xf32>, vector<2x16xf32> -> vector<2x16xf32>
    %230 = arith.addf %228, %229 : vector<2x16xf32>
    %231 = vector.extract_strided_slice %178 {offsets = [2, 0], sizes = [2, 16], strides = [1, 1]} : vector<16x16xf32> to vector<2x16xf32>
    %cst_96 = arith.constant dense<0.000000e+00> : vector<2x16xf32>
    %232 = tpu.matmul %221, %186, %cst_96 {dimension_numbers = #tpu.dot_dimension_numbers<[1], [0], [0], [1], [0, 0, 1, 1], [], []>} : vector<2x16xf32>, vector<16x16xf32>, vector<2x16xf32> -> vector<2x16xf32>
    %233 = arith.addf %231, %232 : vector<2x16xf32>
    %234 = arith.negf %224 : vector<2x16xf32>
    %235 = math.exp %234 : vector<2x16xf32>
    %cst_97 = arith.constant 1.000000e+00 : f32
    %236 = vector.broadcast %cst_97 : f32 to vector<2x16xf32>
    %237 = arith.addf %236, %235 : vector<2x16xf32>
    %238 = arith.divf %236, %237 : vector<2x16xf32>
    %239 = arith.negf %227 : vector<2x16xf32>
    %240 = math.exp %239 : vector<2x16xf32>
    %cst_98 = arith.constant 1.000000e+00 : f32
    %241 = vector.broadcast %cst_98 : f32 to vector<2x16xf32>
    %242 = arith.addf %241, %240 : vector<2x16xf32>
    %243 = arith.divf %241, %242 : vector<2x16xf32>
    %244 = arith.mulf %243, %214 : vector<2x16xf32>
    %245 = math.tanh %230 : vector<2x16xf32>
    %246 = arith.mulf %238, %245 : vector<2x16xf32>
    %247 = arith.addf %244, %246 : vector<2x16xf32>
    %248 = arith.negf %233 : vector<2x16xf32>
    %249 = math.exp %248 : vector<2x16xf32>
    %cst_99 = arith.constant 1.000000e+00 : f32
    %250 = vector.broadcast %cst_99 : f32 to vector<2x16xf32>
    %251 = arith.addf %250, %249 : vector<2x16xf32>
    %252 = arith.divf %250, %251 : vector<2x16xf32>
    %253 = math.tanh %247 : vector<2x16xf32>
    %254 = arith.mulf %252, %253 : vector<2x16xf32>
    %255 = vector.extract_strided_slice %154 {offsets = [4, 0], sizes = [2, 16], strides = [1, 1]} : vector<16x16xf32> to vector<2x16xf32>
    %cst_100 = arith.constant dense<0.000000e+00> : vector<2x16xf32>
    %256 = tpu.matmul %254, %180, %cst_100 {dimension_numbers = #tpu.dot_dimension_numbers<[1], [0], [0], [1], [0, 0, 1, 1], [], []>} : vector<2x16xf32>, vector<16x16xf32>, vector<2x16xf32> -> vector<2x16xf32>
    %257 = arith.addf %255, %256 : vector<2x16xf32>
    %258 = vector.extract_strided_slice %162 {offsets = [4, 0], sizes = [2, 16], strides = [1, 1]} : vector<16x16xf32> to vector<2x16xf32>
    %cst_101 = arith.constant dense<0.000000e+00> : vector<2x16xf32>
    %259 = tpu.matmul %254, %182, %cst_101 {dimension_numbers = #tpu.dot_dimension_numbers<[1], [0], [0], [1], [0, 0, 1, 1], [], []>} : vector<2x16xf32>, vector<16x16xf32>, vector<2x16xf32> -> vector<2x16xf32>
    %260 = arith.addf %258, %259 : vector<2x16xf32>
    %261 = vector.extract_strided_slice %170 {offsets = [4, 0], sizes = [2, 16], strides = [1, 1]} : vector<16x16xf32> to vector<2x16xf32>
    %cst_102 = arith.constant dense<0.000000e+00> : vector<2x16xf32>
    %262 = tpu.matmul %254, %184, %cst_102 {dimension_numbers = #tpu.dot_dimension_numbers<[1], [0], [0], [1], [0, 0, 1, 1], [], []>} : vector<2x16xf32>, vector<16x16xf32>, vector<2x16xf32> -> vector<2x16xf32>
    %263 = arith.addf %261, %262 : vector<2x16xf32>
    %264 = vector.extract_strided_slice %178 {offsets = [4, 0], sizes = [2, 16], strides = [1, 1]} : vector<16x16xf32> to vector<2x16xf32>
    %cst_103 = arith.constant dense<0.000000e+00> : vector<2x16xf32>
    %265 = tpu.matmul %254, %186, %cst_103 {dimension_numbers = #tpu.dot_dimension_numbers<[1], [0], [0], [1], [0, 0, 1, 1], [], []>} : vector<2x16xf32>, vector<16x16xf32>, vector<2x16xf32> -> vector<2x16xf32>
    %266 = arith.addf %264, %265 : vector<2x16xf32>
    %267 = arith.negf %257 : vector<2x16xf32>
    %268 = math.exp %267 : vector<2x16xf32>
    %cst_104 = arith.constant 1.000000e+00 : f32
    %269 = vector.broadcast %cst_104 : f32 to vector<2x16xf32>
    %270 = arith.addf %269, %268 : vector<2x16xf32>
    %271 = arith.divf %269, %270 : vector<2x16xf32>
    %272 = arith.negf %260 : vector<2x16xf32>
    %273 = math.exp %272 : vector<2x16xf32>
    %cst_105 = arith.constant 1.000000e+00 : f32
    %274 = vector.broadcast %cst_105 : f32 to vector<2x16xf32>
    %275 = arith.addf %274, %273 : vector<2x16xf32>
    %276 = arith.divf %274, %275 : vector<2x16xf32>
    %277 = arith.mulf %276, %247 : vector<2x16xf32>
    %278 = math.tanh %263 : vector<2x16xf32>
    %279 = arith.mulf %271, %278 : vector<2x16xf32>
    %280 = arith.addf %277, %279 : vector<2x16xf32>
    %281 = arith.negf %266 : vector<2x16xf32>
    %282 = math.exp %281 : vector<2x16xf32>
    %cst_106 = arith.constant 1.000000e+00 : f32
    %283 = vector.broadcast %cst_106 : f32 to vector<2x16xf32>
    %284 = arith.addf %283, %282 : vector<2x16xf32>
    %285 = arith.divf %283, %284 : vector<2x16xf32>
    %286 = math.tanh %280 : vector<2x16xf32>
    %287 = arith.mulf %285, %286 : vector<2x16xf32>
    %288 = vector.extract_strided_slice %154 {offsets = [6, 0], sizes = [2, 16], strides = [1, 1]} : vector<16x16xf32> to vector<2x16xf32>
    %cst_107 = arith.constant dense<0.000000e+00> : vector<2x16xf32>
    %289 = tpu.matmul %287, %180, %cst_107 {dimension_numbers = #tpu.dot_dimension_numbers<[1], [0], [0], [1], [0, 0, 1, 1], [], []>} : vector<2x16xf32>, vector<16x16xf32>, vector<2x16xf32> -> vector<2x16xf32>
    %290 = arith.addf %288, %289 : vector<2x16xf32>
    %291 = vector.extract_strided_slice %162 {offsets = [6, 0], sizes = [2, 16], strides = [1, 1]} : vector<16x16xf32> to vector<2x16xf32>
    %cst_108 = arith.constant dense<0.000000e+00> : vector<2x16xf32>
    %292 = tpu.matmul %287, %182, %cst_108 {dimension_numbers = #tpu.dot_dimension_numbers<[1], [0], [0], [1], [0, 0, 1, 1], [], []>} : vector<2x16xf32>, vector<16x16xf32>, vector<2x16xf32> -> vector<2x16xf32>
    %293 = arith.addf %291, %292 : vector<2x16xf32>
    %294 = vector.extract_strided_slice %170 {offsets = [6, 0], sizes = [2, 16], strides = [1, 1]} : vector<16x16xf32> to vector<2x16xf32>
    %cst_109 = arith.constant dense<0.000000e+00> : vector<2x16xf32>
    %295 = tpu.matmul %287, %184, %cst_109 {dimension_numbers = #tpu.dot_dimension_numbers<[1], [0], [0], [1], [0, 0, 1, 1], [], []>} : vector<2x16xf32>, vector<16x16xf32>, vector<2x16xf32> -> vector<2x16xf32>
    %296 = arith.addf %294, %295 : vector<2x16xf32>
    %297 = vector.extract_strided_slice %178 {offsets = [6, 0], sizes = [2, 16], strides = [1, 1]} : vector<16x16xf32> to vector<2x16xf32>
    %cst_110 = arith.constant dense<0.000000e+00> : vector<2x16xf32>
    %298 = tpu.matmul %287, %186, %cst_110 {dimension_numbers = #tpu.dot_dimension_numbers<[1], [0], [0], [1], [0, 0, 1, 1], [], []>} : vector<2x16xf32>, vector<16x16xf32>, vector<2x16xf32> -> vector<2x16xf32>
    %299 = arith.addf %297, %298 : vector<2x16xf32>
    %300 = arith.negf %290 : vector<2x16xf32>
    %301 = math.exp %300 : vector<2x16xf32>
    %cst_111 = arith.constant 1.000000e+00 : f32
    %302 = vector.broadcast %cst_111 : f32 to vector<2x16xf32>
    %303 = arith.addf %302, %301 : vector<2x16xf32>
    %304 = arith.divf %302, %303 : vector<2x16xf32>
    %305 = arith.negf %293 : vector<2x16xf32>
    %306 = math.exp %305 : vector<2x16xf32>
    %cst_112 = arith.constant 1.000000e+00 : f32
    %307 = vector.broadcast %cst_112 : f32 to vector<2x16xf32>
    %308 = arith.addf %307, %306 : vector<2x16xf32>
    %309 = arith.divf %307, %308 : vector<2x16xf32>
    %310 = arith.mulf %309, %280 : vector<2x16xf32>
    %311 = math.tanh %296 : vector<2x16xf32>
    %312 = arith.mulf %304, %311 : vector<2x16xf32>
    %313 = arith.addf %310, %312 : vector<2x16xf32>
    %314 = arith.negf %299 : vector<2x16xf32>
    %315 = math.exp %314 : vector<2x16xf32>
    %cst_113 = arith.constant 1.000000e+00 : f32
    %316 = vector.broadcast %cst_113 : f32 to vector<2x16xf32>
    %317 = arith.addf %316, %315 : vector<2x16xf32>
    %318 = arith.divf %316, %317 : vector<2x16xf32>
    %319 = math.tanh %313 : vector<2x16xf32>
    %320 = arith.mulf %318, %319 : vector<2x16xf32>
    %321 = vector.extract_strided_slice %154 {offsets = [8, 0], sizes = [2, 16], strides = [1, 1]} : vector<16x16xf32> to vector<2x16xf32>
    %cst_114 = arith.constant dense<0.000000e+00> : vector<2x16xf32>
    %322 = tpu.matmul %320, %180, %cst_114 {dimension_numbers = #tpu.dot_dimension_numbers<[1], [0], [0], [1], [0, 0, 1, 1], [], []>} : vector<2x16xf32>, vector<16x16xf32>, vector<2x16xf32> -> vector<2x16xf32>
    %323 = arith.addf %321, %322 : vector<2x16xf32>
    %324 = vector.extract_strided_slice %162 {offsets = [8, 0], sizes = [2, 16], strides = [1, 1]} : vector<16x16xf32> to vector<2x16xf32>
    %cst_115 = arith.constant dense<0.000000e+00> : vector<2x16xf32>
    %325 = tpu.matmul %320, %182, %cst_115 {dimension_numbers = #tpu.dot_dimension_numbers<[1], [0], [0], [1], [0, 0, 1, 1], [], []>} : vector<2x16xf32>, vector<16x16xf32>, vector<2x16xf32> -> vector<2x16xf32>
    %326 = arith.addf %324, %325 : vector<2x16xf32>
    %327 = vector.extract_strided_slice %170 {offsets = [8, 0], sizes = [2, 16], strides = [1, 1]} : vector<16x16xf32> to vector<2x16xf32>
    %cst_116 = arith.constant dense<0.000000e+00> : vector<2x16xf32>
    %328 = tpu.matmul %320, %184, %cst_116 {dimension_numbers = #tpu.dot_dimension_numbers<[1], [0], [0], [1], [0, 0, 1, 1], [], []>} : vector<2x16xf32>, vector<16x16xf32>, vector<2x16xf32> -> vector<2x16xf32>
    %329 = arith.addf %327, %328 : vector<2x16xf32>
    %330 = vector.extract_strided_slice %178 {offsets = [8, 0], sizes = [2, 16], strides = [1, 1]} : vector<16x16xf32> to vector<2x16xf32>
    %cst_117 = arith.constant dense<0.000000e+00> : vector<2x16xf32>
    %331 = tpu.matmul %320, %186, %cst_117 {dimension_numbers = #tpu.dot_dimension_numbers<[1], [0], [0], [1], [0, 0, 1, 1], [], []>} : vector<2x16xf32>, vector<16x16xf32>, vector<2x16xf32> -> vector<2x16xf32>
    %332 = arith.addf %330, %331 : vector<2x16xf32>
    %333 = arith.negf %323 : vector<2x16xf32>
    %334 = math.exp %333 : vector<2x16xf32>
    %cst_118 = arith.constant 1.000000e+00 : f32
    %335 = vector.broadcast %cst_118 : f32 to vector<2x16xf32>
    %336 = arith.addf %335, %334 : vector<2x16xf32>
    %337 = arith.divf %335, %336 : vector<2x16xf32>
    %338 = arith.negf %326 : vector<2x16xf32>
    %339 = math.exp %338 : vector<2x16xf32>
    %cst_119 = arith.constant 1.000000e+00 : f32
    %340 = vector.broadcast %cst_119 : f32 to vector<2x16xf32>
    %341 = arith.addf %340, %339 : vector<2x16xf32>
    %342 = arith.divf %340, %341 : vector<2x16xf32>
    %343 = arith.mulf %342, %313 : vector<2x16xf32>
    %344 = math.tanh %329 : vector<2x16xf32>
    %345 = arith.mulf %337, %344 : vector<2x16xf32>
    %346 = arith.addf %343, %345 : vector<2x16xf32>
    %347 = arith.negf %332 : vector<2x16xf32>
    %348 = math.exp %347 : vector<2x16xf32>
    %cst_120 = arith.constant 1.000000e+00 : f32
    %349 = vector.broadcast %cst_120 : f32 to vector<2x16xf32>
    %350 = arith.addf %349, %348 : vector<2x16xf32>
    %351 = arith.divf %349, %350 : vector<2x16xf32>
    %352 = math.tanh %346 : vector<2x16xf32>
    %353 = arith.mulf %351, %352 : vector<2x16xf32>
    %354 = vector.extract_strided_slice %154 {offsets = [10, 0], sizes = [2, 16], strides = [1, 1]} : vector<16x16xf32> to vector<2x16xf32>
    %cst_121 = arith.constant dense<0.000000e+00> : vector<2x16xf32>
    %355 = tpu.matmul %353, %180, %cst_121 {dimension_numbers = #tpu.dot_dimension_numbers<[1], [0], [0], [1], [0, 0, 1, 1], [], []>} : vector<2x16xf32>, vector<16x16xf32>, vector<2x16xf32> -> vector<2x16xf32>
    %356 = arith.addf %354, %355 : vector<2x16xf32>
    %357 = vector.extract_strided_slice %162 {offsets = [10, 0], sizes = [2, 16], strides = [1, 1]} : vector<16x16xf32> to vector<2x16xf32>
    %cst_122 = arith.constant dense<0.000000e+00> : vector<2x16xf32>
    %358 = tpu.matmul %353, %182, %cst_122 {dimension_numbers = #tpu.dot_dimension_numbers<[1], [0], [0], [1], [0, 0, 1, 1], [], []>} : vector<2x16xf32>, vector<16x16xf32>, vector<2x16xf32> -> vector<2x16xf32>
    %359 = arith.addf %357, %358 : vector<2x16xf32>
    %360 = vector.extract_strided_slice %170 {offsets = [10, 0], sizes = [2, 16], strides = [1, 1]} : vector<16x16xf32> to vector<2x16xf32>
    %cst_123 = arith.constant dense<0.000000e+00> : vector<2x16xf32>
    %361 = tpu.matmul %353, %184, %cst_123 {dimension_numbers = #tpu.dot_dimension_numbers<[1], [0], [0], [1], [0, 0, 1, 1], [], []>} : vector<2x16xf32>, vector<16x16xf32>, vector<2x16xf32> -> vector<2x16xf32>
    %362 = arith.addf %360, %361 : vector<2x16xf32>
    %363 = vector.extract_strided_slice %178 {offsets = [10, 0], sizes = [2, 16], strides = [1, 1]} : vector<16x16xf32> to vector<2x16xf32>
    %cst_124 = arith.constant dense<0.000000e+00> : vector<2x16xf32>
    %364 = tpu.matmul %353, %186, %cst_124 {dimension_numbers = #tpu.dot_dimension_numbers<[1], [0], [0], [1], [0, 0, 1, 1], [], []>} : vector<2x16xf32>, vector<16x16xf32>, vector<2x16xf32> -> vector<2x16xf32>
    %365 = arith.addf %363, %364 : vector<2x16xf32>
    %366 = arith.negf %356 : vector<2x16xf32>
    %367 = math.exp %366 : vector<2x16xf32>
    %cst_125 = arith.constant 1.000000e+00 : f32
    %368 = vector.broadcast %cst_125 : f32 to vector<2x16xf32>
    %369 = arith.addf %368, %367 : vector<2x16xf32>
    %370 = arith.divf %368, %369 : vector<2x16xf32>
    %371 = arith.negf %359 : vector<2x16xf32>
    %372 = math.exp %371 : vector<2x16xf32>
    %cst_126 = arith.constant 1.000000e+00 : f32
    %373 = vector.broadcast %cst_126 : f32 to vector<2x16xf32>
    %374 = arith.addf %373, %372 : vector<2x16xf32>
    %375 = arith.divf %373, %374 : vector<2x16xf32>
    %376 = arith.mulf %375, %346 : vector<2x16xf32>
    %377 = math.tanh %362 : vector<2x16xf32>
    %378 = arith.mulf %370, %377 : vector<2x16xf32>
    %379 = arith.addf %376, %378 : vector<2x16xf32>
    %380 = arith.negf %365 : vector<2x16xf32>
    %381 = math.exp %380 : vector<2x16xf32>
    %cst_127 = arith.constant 1.000000e+00 : f32
    %382 = vector.broadcast %cst_127 : f32 to vector<2x16xf32>
    %383 = arith.addf %382, %381 : vector<2x16xf32>
    %384 = arith.divf %382, %383 : vector<2x16xf32>
    %385 = math.tanh %379 : vector<2x16xf32>
    %386 = arith.mulf %384, %385 : vector<2x16xf32>
    %387 = vector.extract_strided_slice %154 {offsets = [12, 0], sizes = [2, 16], strides = [1, 1]} : vector<16x16xf32> to vector<2x16xf32>
    %cst_128 = arith.constant dense<0.000000e+00> : vector<2x16xf32>
    %388 = tpu.matmul %386, %180, %cst_128 {dimension_numbers = #tpu.dot_dimension_numbers<[1], [0], [0], [1], [0, 0, 1, 1], [], []>} : vector<2x16xf32>, vector<16x16xf32>, vector<2x16xf32> -> vector<2x16xf32>
    %389 = arith.addf %387, %388 : vector<2x16xf32>
    %390 = vector.extract_strided_slice %162 {offsets = [12, 0], sizes = [2, 16], strides = [1, 1]} : vector<16x16xf32> to vector<2x16xf32>
    %cst_129 = arith.constant dense<0.000000e+00> : vector<2x16xf32>
    %391 = tpu.matmul %386, %182, %cst_129 {dimension_numbers = #tpu.dot_dimension_numbers<[1], [0], [0], [1], [0, 0, 1, 1], [], []>} : vector<2x16xf32>, vector<16x16xf32>, vector<2x16xf32> -> vector<2x16xf32>
    %392 = arith.addf %390, %391 : vector<2x16xf32>
    %393 = vector.extract_strided_slice %170 {offsets = [12, 0], sizes = [2, 16], strides = [1, 1]} : vector<16x16xf32> to vector<2x16xf32>
    %cst_130 = arith.constant dense<0.000000e+00> : vector<2x16xf32>
    %394 = tpu.matmul %386, %184, %cst_130 {dimension_numbers = #tpu.dot_dimension_numbers<[1], [0], [0], [1], [0, 0, 1, 1], [], []>} : vector<2x16xf32>, vector<16x16xf32>, vector<2x16xf32> -> vector<2x16xf32>
    %395 = arith.addf %393, %394 : vector<2x16xf32>
    %396 = vector.extract_strided_slice %178 {offsets = [12, 0], sizes = [2, 16], strides = [1, 1]} : vector<16x16xf32> to vector<2x16xf32>
    %cst_131 = arith.constant dense<0.000000e+00> : vector<2x16xf32>
    %397 = tpu.matmul %386, %186, %cst_131 {dimension_numbers = #tpu.dot_dimension_numbers<[1], [0], [0], [1], [0, 0, 1, 1], [], []>} : vector<2x16xf32>, vector<16x16xf32>, vector<2x16xf32> -> vector<2x16xf32>
    %398 = arith.addf %396, %397 : vector<2x16xf32>
    %399 = arith.negf %389 : vector<2x16xf32>
    %400 = math.exp %399 : vector<2x16xf32>
    %cst_132 = arith.constant 1.000000e+00 : f32
    %401 = vector.broadcast %cst_132 : f32 to vector<2x16xf32>
    %402 = arith.addf %401, %400 : vector<2x16xf32>
    %403 = arith.divf %401, %402 : vector<2x16xf32>
    %404 = arith.negf %392 : vector<2x16xf32>
    %405 = math.exp %404 : vector<2x16xf32>
    %cst_133 = arith.constant 1.000000e+00 : f32
    %406 = vector.broadcast %cst_133 : f32 to vector<2x16xf32>
    %407 = arith.addf %406, %405 : vector<2x16xf32>
    %408 = arith.divf %406, %407 : vector<2x16xf32>
    %409 = arith.mulf %408, %379 : vector<2x16xf32>
    %410 = math.tanh %395 : vector<2x16xf32>
    %411 = arith.mulf %403, %410 : vector<2x16xf32>
    %412 = arith.addf %409, %411 : vector<2x16xf32>
    %413 = arith.negf %398 : vector<2x16xf32>
    %414 = math.exp %413 : vector<2x16xf32>
    %cst_134 = arith.constant 1.000000e+00 : f32
    %415 = vector.broadcast %cst_134 : f32 to vector<2x16xf32>
    %416 = arith.addf %415, %414 : vector<2x16xf32>
    %417 = arith.divf %415, %416 : vector<2x16xf32>
    %418 = math.tanh %412 : vector<2x16xf32>
    %419 = arith.mulf %417, %418 : vector<2x16xf32>
    %420 = vector.extract_strided_slice %154 {offsets = [14, 0], sizes = [2, 16], strides = [1, 1]} : vector<16x16xf32> to vector<2x16xf32>
    %cst_135 = arith.constant dense<0.000000e+00> : vector<2x16xf32>
    %421 = tpu.matmul %419, %180, %cst_135 {dimension_numbers = #tpu.dot_dimension_numbers<[1], [0], [0], [1], [0, 0, 1, 1], [], []>} : vector<2x16xf32>, vector<16x16xf32>, vector<2x16xf32> -> vector<2x16xf32>
    %422 = arith.addf %420, %421 : vector<2x16xf32>
    %423 = vector.extract_strided_slice %162 {offsets = [14, 0], sizes = [2, 16], strides = [1, 1]} : vector<16x16xf32> to vector<2x16xf32>
    %cst_136 = arith.constant dense<0.000000e+00> : vector<2x16xf32>
    %424 = tpu.matmul %419, %182, %cst_136 {dimension_numbers = #tpu.dot_dimension_numbers<[1], [0], [0], [1], [0, 0, 1, 1], [], []>} : vector<2x16xf32>, vector<16x16xf32>, vector<2x16xf32> -> vector<2x16xf32>
    %425 = arith.addf %423, %424 : vector<2x16xf32>
    %426 = vector.extract_strided_slice %170 {offsets = [14, 0], sizes = [2, 16], strides = [1, 1]} : vector<16x16xf32> to vector<2x16xf32>
    %cst_137 = arith.constant dense<0.000000e+00> : vector<2x16xf32>
    %427 = tpu.matmul %419, %184, %cst_137 {dimension_numbers = #tpu.dot_dimension_numbers<[1], [0], [0], [1], [0, 0, 1, 1], [], []>} : vector<2x16xf32>, vector<16x16xf32>, vector<2x16xf32> -> vector<2x16xf32>
    %428 = arith.addf %426, %427 : vector<2x16xf32>
    %429 = vector.extract_strided_slice %178 {offsets = [14, 0], sizes = [2, 16], strides = [1, 1]} : vector<16x16xf32> to vector<2x16xf32>
    %cst_138 = arith.constant dense<0.000000e+00> : vector<2x16xf32>
    %430 = tpu.matmul %419, %186, %cst_138 {dimension_numbers = #tpu.dot_dimension_numbers<[1], [0], [0], [1], [0, 0, 1, 1], [], []>} : vector<2x16xf32>, vector<16x16xf32>, vector<2x16xf32> -> vector<2x16xf32>
    %431 = arith.addf %429, %430 : vector<2x16xf32>
    %432 = arith.negf %422 : vector<2x16xf32>
    %433 = math.exp %432 : vector<2x16xf32>
    %cst_139 = arith.constant 1.000000e+00 : f32
    %434 = vector.broadcast %cst_139 : f32 to vector<2x16xf32>
    %435 = arith.addf %434, %433 : vector<2x16xf32>
    %436 = arith.divf %434, %435 : vector<2x16xf32>
    %437 = arith.negf %425 : vector<2x16xf32>
    %438 = math.exp %437 : vector<2x16xf32>
    %cst_140 = arith.constant 1.000000e+00 : f32
    %439 = vector.broadcast %cst_140 : f32 to vector<2x16xf32>
    %440 = arith.addf %439, %438 : vector<2x16xf32>
    %441 = arith.divf %439, %440 : vector<2x16xf32>
    %442 = arith.mulf %441, %412 : vector<2x16xf32>
    %443 = math.tanh %428 : vector<2x16xf32>
    %444 = arith.mulf %436, %443 : vector<2x16xf32>
    %445 = arith.addf %442, %444 : vector<2x16xf32>
    %446 = arith.negf %431 : vector<2x16xf32>
    %447 = math.exp %446 : vector<2x16xf32>
    %cst_141 = arith.constant 1.000000e+00 : f32
    %448 = vector.broadcast %cst_141 : f32 to vector<2x16xf32>
    %449 = arith.addf %448, %447 : vector<2x16xf32>
    %450 = arith.divf %448, %449 : vector<2x16xf32>
    %451 = math.tanh %445 : vector<2x16xf32>
    %452 = arith.mulf %450, %451 : vector<2x16xf32>
    %c0_142 = arith.constant 0 : index
    %c0_143 = arith.constant 0 : index
    %c0_144 = arith.constant 0 : index
    %453 = vector.load %arg7[%c0_142, %c0_143, %c0_144] : memref<4x128x128xf32, #tpu.memory_space<vmem>>, vector<1x128x128xf32>
    %454 = vector.shape_cast %453 : vector<1x128x128xf32> to vector<128x128xf32>
    %455 = vector.extract_strided_slice %454 {offsets = [0, 0], sizes = [16, 128], strides = [1, 1]} : vector<128x128xf32> to vector<16x128xf32>
    %cst_145 = arith.constant dense<0.000000e+00> : vector<1x128xf32>
    %456 = tpu.matmul %145, %455, %cst_145 {dimension_numbers = #tpu.dot_dimension_numbers<[1], [0], [0], [1], [0, 0, 1, 1], [], []>} : vector<1x16xf32>, vector<16x128xf32>, vector<1x128xf32> -> vector<1x128xf32>
    %457 = vector.extract_strided_slice %454 {offsets = [16, 0], sizes = [16, 128], strides = [1, 1]} : vector<128x128xf32> to vector<16x128xf32>
    %cst_146 = arith.constant dense<0.000000e+00> : vector<2x128xf32>
    %458 = tpu.matmul %452, %457, %cst_146 {dimension_numbers = #tpu.dot_dimension_numbers<[1], [0], [0], [1], [0, 0, 1, 1], [], []>} : vector<2x16xf32>, vector<16x128xf32>, vector<2x128xf32> -> vector<2x128xf32>
    %459 = vector.broadcast %456 : vector<1x128xf32> to vector<2x128xf32>
    %460 = arith.addf %458, %459 : vector<2x128xf32>
    %c0_147 = arith.constant 0 : index
    %c0_148 = arith.constant 0 : index
    %461 = vector.load %arg8[%c0_147, %c0_148] : memref<4x128xf32, #tpu.memory_space<vmem>>, vector<1x128xf32>
    %462 = vector.shape_cast %461 : vector<1x128xf32> to vector<128xf32>
    %463 = vector.shape_cast %462 : vector<128xf32> to vector<1x128xf32>
    %464 = vector.broadcast %463 : vector<1x128xf32> to vector<2x128xf32>
    %465 = arith.addf %460, %464 : vector<2x128xf32>
    %cst_149 = arith.constant 5.000000e-01 : f32
    %466 = vector.broadcast %cst_149 : f32 to vector<2x128xf32>
    %467 = arith.mulf %466, %465 : vector<2x128xf32>
    %cst_150 = arith.constant 0.707106769 : f32
    %468 = vector.broadcast %cst_150 : f32 to vector<2x128xf32>
    %469 = arith.mulf %465, %468 : vector<2x128xf32>
    %470 = math.erf %469 : vector<2x128xf32>
    %cst_151 = arith.constant 1.000000e+00 : f32
    %471 = vector.broadcast %cst_151 : f32 to vector<2x128xf32>
    %472 = arith.addf %471, %470 : vector<2x128xf32>
    %473 = arith.mulf %467, %472 : vector<2x128xf32>
    %c1_152 = arith.constant 1 : index
    %c0_153 = arith.constant 0 : index
    %c0_154 = arith.constant 0 : index
    %474 = vector.load %arg7[%c1_152, %c0_153, %c0_154] : memref<4x128x128xf32, #tpu.memory_space<vmem>>, vector<1x128x128xf32>
    %475 = vector.shape_cast %474 : vector<1x128x128xf32> to vector<128x128xf32>
    %cst_155 = arith.constant dense<0.000000e+00> : vector<2x128xf32>
    %476 = tpu.matmul %473, %475, %cst_155 {dimension_numbers = #tpu.dot_dimension_numbers<[1], [0], [0], [1], [0, 0, 1, 1], [], []>} : vector<2x128xf32>, vector<128x128xf32>, vector<2x128xf32> -> vector<2x128xf32>
    %c1_156 = arith.constant 1 : index
    %c0_157 = arith.constant 0 : index
    %477 = vector.load %arg8[%c1_156, %c0_157] : memref<4x128xf32, #tpu.memory_space<vmem>>, vector<1x128xf32>
    %478 = vector.shape_cast %477 : vector<1x128xf32> to vector<128xf32>
    %479 = vector.shape_cast %478 : vector<128xf32> to vector<1x128xf32>
    %480 = vector.broadcast %479 : vector<1x128xf32> to vector<2x128xf32>
    %481 = arith.addf %476, %480 : vector<2x128xf32>
    %cst_158 = arith.constant 5.000000e-01 : f32
    %482 = vector.broadcast %cst_158 : f32 to vector<2x128xf32>
    %483 = arith.mulf %482, %481 : vector<2x128xf32>
    %cst_159 = arith.constant 0.707106769 : f32
    %484 = vector.broadcast %cst_159 : f32 to vector<2x128xf32>
    %485 = arith.mulf %481, %484 : vector<2x128xf32>
    %486 = math.erf %485 : vector<2x128xf32>
    %cst_160 = arith.constant 1.000000e+00 : f32
    %487 = vector.broadcast %cst_160 : f32 to vector<2x128xf32>
    %488 = arith.addf %487, %486 : vector<2x128xf32>
    %489 = arith.mulf %483, %488 : vector<2x128xf32>
    %c2_161 = arith.constant 2 : index
    %c0_162 = arith.constant 0 : index
    %c0_163 = arith.constant 0 : index
    %490 = vector.load %arg7[%c2_161, %c0_162, %c0_163] : memref<4x128x128xf32, #tpu.memory_space<vmem>>, vector<1x128x128xf32>
    %491 = vector.shape_cast %490 : vector<1x128x128xf32> to vector<128x128xf32>
    %cst_164 = arith.constant dense<0.000000e+00> : vector<2x128xf32>
    %492 = tpu.matmul %489, %491, %cst_164 {dimension_numbers = #tpu.dot_dimension_numbers<[1], [0], [0], [1], [0, 0, 1, 1], [], []>} : vector<2x128xf32>, vector<128x128xf32>, vector<2x128xf32> -> vector<2x128xf32>
    %c2_165 = arith.constant 2 : index
    %c0_166 = arith.constant 0 : index
    %493 = vector.load %arg8[%c2_165, %c0_166] : memref<4x128xf32, #tpu.memory_space<vmem>>, vector<1x128xf32>
    %494 = vector.shape_cast %493 : vector<1x128xf32> to vector<128xf32>
    %495 = vector.shape_cast %494 : vector<128xf32> to vector<1x128xf32>
    %496 = vector.broadcast %495 : vector<1x128xf32> to vector<2x128xf32>
    %497 = arith.addf %492, %496 : vector<2x128xf32>
    %cst_167 = arith.constant 5.000000e-01 : f32
    %498 = vector.broadcast %cst_167 : f32 to vector<2x128xf32>
    %499 = arith.mulf %498, %497 : vector<2x128xf32>
    %cst_168 = arith.constant 0.707106769 : f32
    %500 = vector.broadcast %cst_168 : f32 to vector<2x128xf32>
    %501 = arith.mulf %497, %500 : vector<2x128xf32>
    %502 = math.erf %501 : vector<2x128xf32>
    %cst_169 = arith.constant 1.000000e+00 : f32
    %503 = vector.broadcast %cst_169 : f32 to vector<2x128xf32>
    %504 = arith.addf %503, %502 : vector<2x128xf32>
    %505 = arith.mulf %499, %504 : vector<2x128xf32>
    %c3_170 = arith.constant 3 : index
    %c0_171 = arith.constant 0 : index
    %c0_172 = arith.constant 0 : index
    %506 = vector.load %arg7[%c3_170, %c0_171, %c0_172] : memref<4x128x128xf32, #tpu.memory_space<vmem>>, vector<1x128x128xf32>
    %507 = vector.shape_cast %506 : vector<1x128x128xf32> to vector<128x128xf32>
    %cst_173 = arith.constant dense<0.000000e+00> : vector<2x128xf32>
    %508 = tpu.matmul %505, %507, %cst_173 {dimension_numbers = #tpu.dot_dimension_numbers<[1], [0], [0], [1], [0, 0, 1, 1], [], []>} : vector<2x128xf32>, vector<128x128xf32>, vector<2x128xf32> -> vector<2x128xf32>
    %c3_174 = arith.constant 3 : index
    %c0_175 = arith.constant 0 : index
    %509 = vector.load %arg8[%c3_174, %c0_175] : memref<4x128xf32, #tpu.memory_space<vmem>>, vector<1x128xf32>
    %510 = vector.shape_cast %509 : vector<1x128xf32> to vector<128xf32>
    %511 = vector.shape_cast %510 : vector<128xf32> to vector<1x128xf32>
    %512 = vector.broadcast %511 : vector<1x128xf32> to vector<2x128xf32>
    %513 = arith.addf %508, %512 : vector<2x128xf32>
    %c0_176 = arith.constant 0 : index
    %c0_177 = arith.constant 0 : index
    %514 = vector.load %arg9[%c0_176, %c0_177] : memref<2x128xf32, #tpu.memory_space<vmem>>, vector<2x128xf32>
    tpu.vector_store %arg9[%c0_176, %c0_177], %513 {strides = array<i32>} : memref<2x128xf32, #tpu.memory_space<vmem>>, vector<2x128xf32>,
    return
  }
}

</mosaic_0001>

<bundles_post_ra>
// kernel: tpu_custom_call.1
= control target key start
LH: loop header
LB: loop body
LE: loop exit
PB: predicated region body
PF: predicated region fallthrough
CT: control target
= control target key end

     0   :  { %14 = vsyncpa [#allocation3], 0  ;;  %s5772_s0 = inlined_call_operand.vmem [shape: f32[16,16], index: 0, kind: input, shape index: {}]   ;;  %s5773_s1 = inlined_call_operand.vmem [shape: f32[16,1], index: 1, kind: input, shape index: {}]   ;;  %s5774_s2 = inlined_call_operand.hbm [shape: f32[14,16], index: 2, kind: input, shape index: {}]   ;;  %s5775_s3 = inlined_call_operand.vmem [shape: f32[2,16,16], index: 3, kind: input, shape index: {}]   ;;  %s5776_s4 = inlined_call_operand.vmem [shape: f32[16,8], index: 4, kind: input, shape index: {}]   ;;  %s5777_s5 = inlined_call_operand.hbm [shape: f32[4,8,16], index: 5, kind: input, shape index: {}]   ;;  %s5778_s6 = inlined_call_operand.hbm [shape: f32[4,16,16], index: 6, kind: input, shape index: {}]   ;;  %s5779_s7 = inlined_call_operand.hbm [shape: f32[4,128,128], index: 7, kind: input, shape index: {}]   ;;  %s5780_s8 = inlined_call_operand.vmem [shape: f32[4,128], index: 8, kind: input, shape index: {}]   ;;  %s5781_s9 = inlined_call_operand.hbm [shape: f32[2,128], index: 9, kind: output, shape index: {}]  }
   0x1   :  { %15 = vsyncpa [#allocation6], 0 }
   0x2   :  { %16 = vsyncpa [#allocation9], 0 }
   0x3   :  { %17 = vsyncpa [#allocation4], 0  ;;  %s5252_s30 = smov [#allocation5]   ;;  %s5253_s11 = smov [#allocation2]  }
   0x4   :  { %s43_s10 = sshll.u32 %s5252_s30, 4  ;;  %s27_s12 = sshll.u32 %s5253_s11, 4  ;;  %s44_s10 = int_to_ptr.vmem [resolvable:$true] %s43_s10  ;;  %s5313_s12 = int_to_ptr.vmem [resolvable:$true] %s27_s12 }
   0x5   :  { %s5134_s15 = scalar_lea.hbm %s5777_s5, 512 }
   0x6   :  { %p5135_p0 = scmp.ne.s32.totalorder %s5777_s5, %s5134_s15  ;;  %p5138_p1 = scmp.lt.u32.totalorder %s5134_s15, %s5777_s5 }
   0x8   :  { %p5140_p2 = pnand %p5138_p1, %p5135_p0 }
   0xa   :  { %5143 = shalt.err (!%p5140_p2)
}
   0xb   :  { %s5144_s20 = scalar_lea.vmem %s44_s10, 512  ;;  %p5149_p4 = scmp.lt.s32.totalorder %s44_s10, %s44_s10 }
   0xc   :  { %p5145_p3 = scmp.ne.s32.totalorder %s44_s10, %s5144_s20  ;;  %p5150_p5 = scmp.lt.s32.totalorder %s5144_s20, %s5144_s20 }
   0xe   :  { %p5151_p6 = por %p5150_p5, %p5149_p4 }
  0x10   :  { %p5152_p7 = pnand %p5151_p6, %p5145_p3 }
  0x12   :  { %5155 = shalt.err (!%p5152_p7)
}
  0x13   :  { %s5254_s21 = smov 128   ;;  %s5255_s22 = smov 8  }
  0x14   :  { %49 = dma.hbm_to_vmem [thread:$0]  %s5777_s5, 512, %s44_s10, [#allocation6], %s5254_s21, %s5254_s21, %s5255_s22  }
  0x15   :  { %s5156_s27 = scalar_lea.hbm %s5774_s2, 256 }
  0x16   :  { %p5157_p8 = scmp.ne.s32.totalorder %s5774_s2, %s5156_s27  ;;  %p5160_p9 = scmp.lt.u32.totalorder %s5156_s27, %s5774_s2 }
  0x18   :  { %p5162_p10 = pnand %p5160_p9, %p5157_p8 }
  0x1a   :  { %5165 = shalt.err (!%p5162_p10)
}
  0x1b   :  { %s5166_s13 = scalar_lea.vmem %s5313_s12, 256  ;;  %p5171_p12 = scmp.lt.s32.totalorder %s5313_s12, %s5313_s12 }
  0x1c   :  { %p5167_p11 = scmp.ne.s32.totalorder %s5313_s12, %s5166_s13  ;;  %p5172_p13 = scmp.lt.s32.totalorder %s5166_s13, %s5166_s13 }
  0x1e   :  { %p5173_p0 = por %p5172_p13, %p5171_p12 }
  0x20   :  { %p5174_p1 = pnand %p5173_p0, %p5167_p11 }
  0x22   :  { %5177 = shalt.err (!%p5174_p1)
}
  0x23   :  { %33 = dma.hbm_to_vmem [thread:$0]  %s5774_s2, 256, %s5313_s12, [#allocation3], %s5254_s21, %s5254_s21, %s5255_s22  }
  0x24   :  { %s5256_s14 = smov [#allocation7]   ;;  %s5257_s16 = smov [#allocation8]  }
  0x25   :  { %s55_s15 = sshll.u32 %s5256_s14, 4  ;;  %s67_s17 = sshll.u32 %s5257_s16, 4  ;;  %s56_s15 = int_to_ptr.vmem [resolvable:$true] %s55_s15  ;;  %s5350_s17 = int_to_ptr.vmem [resolvable:$true] %s67_s17 }
  0x26   :  { %s5178_s20 = scalar_lea.hbm %s5778_s6, 1024 }
  0x27   :  { %p5179_p2 = scmp.ne.s32.totalorder %s5778_s6, %s5178_s20  ;;  %p5182_p3 = scmp.lt.u32.totalorder %s5178_s20, %s5778_s6 }
  0x29   :  { %p5184_p4 = pnand %p5182_p3, %p5179_p2 }
  0x2b   :  { %5187 = shalt.err (!%p5184_p4)
}
  0x2c   :  { %s5188_s2 = scalar_lea.vmem %s56_s15, 1024  ;;  %p5193_p6 = scmp.lt.s32.totalorder %s56_s15, %s56_s15 }
  0x2d   :  { %p5189_p5 = scmp.ne.s32.totalorder %s56_s15, %s5188_s2  ;;  %p5194_p7 = scmp.lt.s32.totalorder %s5188_s2, %s5188_s2 }
  0x2f   :  { %p5195_p8 = por %p5194_p7, %p5193_p6 }
  0x31   :  { %p5196_p9 = pnand %p5195_p8, %p5189_p5 }
  0x33   :  { %5199 = shalt.err (!%p5196_p9)
}
  0x34   :  { %61 = dma.hbm_to_vmem [thread:$0]  %s5778_s6, 1024, %s56_s15, [#allocation6], %s5254_s21, %s5254_s21, %s5255_s22  }
  0x35   :  { %s5200_s30 = scalar_lea.hbm %s5779_s7, 8192 }
  0x36   :  { %p5201_p10 = scmp.ne.s32.totalorder %s5779_s7, %s5200_s30  ;;  %p5204_p11 = scmp.lt.u32.totalorder %s5200_s30, %s5779_s7 }
  0x38   :  { %p5206_p12 = pnand %p5204_p11, %p5201_p10 }
  0x3a   :  { %5209 = shalt.err (!%p5206_p12)
}
  0x3b   :  { %s5210_s14 = scalar_lea.vmem %s5350_s17, 8192  ;;  %p5215_p0 = scmp.lt.s32.totalorder %s5350_s17, %s5350_s17 }
  0x3c   :  { %p5211_p13 = scmp.ne.s32.totalorder %s5350_s17, %s5210_s14  ;;  %p5216_p1 = scmp.lt.s32.totalorder %s5210_s14, %s5210_s14 }
  0x3e   :  { %p5217_p2 = por %p5216_p1, %p5215_p0 }
  0x40   :  { %p5218_p3 = pnand %p5217_p2, %p5211_p13 }
  0x42   :  { %5221 = shalt.err (!%p5218_p3)
}
  0x43   :  { %73 = dma.hbm_to_vmem [thread:$0]  %s5779_s7, 8192, %s5350_s17, [#allocation9], %s5254_s21, %s5254_s21, %s5255_s22  }
  0x44   :  { %5244 = dma.done.wait [#allocation3], 256  }
  0x45   :  { %5245 = vsyncadd [#allocation3], 4294967040 }
  0x46   :  { %5246 = dma.done.wait [#allocation6], 1536  }
  0x47   :  { %5247 = vsyncadd [#allocation6], 4294965760 }
  0x48   :  { %5248 = dma.done.wait [#allocation9], 8192  }
  0x49   :  { %5249 = vsyncadd [#allocation9], 4294959104  ;;  %v5258_v0 = vmov 0   ;;  %v90_v1 = vld [vmem:[%s5773_s1] sm:$0xff]  ;;  %v91_v2 = vld [vmem:[%s5773_s1 + $0x8] sm:$0xff]  ;;  %vm114_vm0 = vcmask 130048  }
  0x4a   :  { %4981 = vset.pattern.permute.xlu0 %v5258_v0  ;;  %v5396_v3 = vld [vmem:[%s5772_s0] sm:$0xff]  ;;  %v5409_v10 = vld [vmem:[%s5772_s0 + $0x8] sm:$0xff]  ;;  %vm706_vm1 = vcmask 64512   ;;  %vm5260_vm2 = vmmov 0   ;;  %s5262_s15 = smov [#allocation10]  }
  0x4b   :  { %95 = vperm.xlu0 %4981, %v90_v1   ;;  %4382 = vmatprep.mubr.msk.f32.mxu0 %vm114_vm0, %v5396_v3  ;;  %v4101_v5 = vld [vmem:[#allocation2] ss:$0 sm:$0xff]  ;;  %v252_v12 = vld [vmem:[%s5775_s3 + $0x8] sm:$0xff]  ;;  %v4102_v14 = vld [vmem:[#allocation2 + $0x1] ss:$0 sm:$0xff]  ;;  %s4090_s16 = sshll.u32 %s5262_s15, 4  ;;  %s4091_s16 = int_to_ptr.vmem [resolvable:$true] %s4090_s16 }
  0x4c   :  { %v251_v11 = vld [vmem:[%s5775_s3] sm:$0xff]  ;;  %s5222_s18 = scalar_lea.vmem %s4091_s16, 32  ;;  %p5227_p5 = scmp.lt.s32.totalorder %s4091_s16, %s4091_s16 }
  0x4d   :  { %v4780_v13 = vpack.c.bf16 %v252_v12, %v251_v11  ;;  %v4105_v47 = vld [vmem:[#allocation2 + $0x2] ss:$0 sm:$0xff]  ;;  %v4106_v50 = vld [vmem:[#allocation2 + $0x3] ss:$0 sm:$0xff]  ;;  %v4109_v11 = vld [vmem:[#allocation2 + $0x4] ss:$0 sm:$0xff]  ;;  %p5223_p4 = scmp.ne.s32.totalorder %s4091_s16, %s5222_s18  ;;  %p5228_p6 = scmp.lt.s32.totalorder %s5222_s18, %s5222_s18 }
  0x4f   :  { %100 = vperm.xlu0 %4981, %v91_v2   ;;  %p5229_p7 = por %p5228_p6, %p5227_p5 }
  0x51   :  { %p5230_p8 = pnand %p5229_p7, %p5223_p4 }
  0xca   :  { %v5400_v4 = vpop.permute.xlu0 %95 }
  0xcb   :  { %v107_v7 = vmul.f32 %v4101_v5, %v5400_v4 }
  0xce   :  { %v5402_v6 = vpop.permute.xlu0 %100 }
  0xcf   :  { %v108_v8 = vmul.f32 %v4101_v5, %v5402_v6 }
  0xd1   :  { %v4776_v9 = vpack.c.bf16 %v108_v8, %v107_v7  ;;  %v4114_v7 = vld [vmem:[%s5775_s3 + $0x10] sm:$0xff]  ;;  %v4115_v8 = vld [vmem:[%s5775_s3 + $0x18] sm:$0xff] }
  0xd3   :  { %4777 = vmatprep.subr.bf16.mxu0 %v4776_v9 }
  0xd4   :  { %4779 = vmatpush3.bf16.msra.mxu0 %v4776_v9  ;;  %v4788_v9 = vpack.c.bf16 %v4115_v8, %v4114_v7  ;;  %v5261_v7 = vmov 0.0   ;;  %v1040_v8 = vld [vmem:[#allocation7 + $0x20] sm:$0xff] }
  0xd5   :  { %4781 = vmatprep.subr.bf16.mxu0 %v4780_v13 }
  0xd7   :  { %4383 = vmatmul.mubr.msk.f32.vlgmr.msra.gmra.mrb[0].mxu0 %vm114_vm0, %v5409_v10 }
  0xd8   :  { %4783 = vmatpush3.bf16.msra.mxu0 %v4780_v13 }
 0x1aa   :  { %v4384_v15 = vpop.f32.mrb[0].mxu0 }
 0x1ab   :  { %v193_v16 = vadd.f32 %v4384_v15, %v4102_v14  ;;  %v187_v17 = vpop.f32.mrb[1].mxu0 }
 0x1ac   :  { %v188_v18 = vadd.f32 %v4102_v14, %v187_v17 }
 0x1ad   :  { %v199_v19 = vsel %vm114_vm0, %v193_v16, 0.0  ;;  %v210_v20 = vmul.f32 %v193_v16, %v193_v16 }
 0x1ae   :  { %v198_v21 = vsel %vm114_vm0, %v188_v18, 0.0  ;;  %v209_v22 = vmul.f32 %v188_v18, %v188_v18 }
 0x1af   :  { %v212_v23 = vsel %vm114_vm0, %v210_v20, 0.0  ;;  %v200_v24 = vadd.f32 %v199_v19, %v198_v21 }
 0x1b0   :  { %v211_v25 = vsel %vm114_vm0, %v209_v22, 0.0 }
 0x1b1   :  { %v201_v26 = vrot.slane %v200_v24, 4  ;;  %v213_v27 = vadd.f32 %v212_v23, %v211_v25 }
 0x1b3   :  { %v202_v28 = vadd.f32 %v201_v26, %v200_v24  ;;  %v214_v29 = vrot.slane %v213_v27, 4 }
 0x1b5   :  { %v203_v30 = vrot.slane %v202_v28, 2  ;;  %v215_v31 = vadd.f32 %v214_v29, %v213_v27 }
 0x1b7   :  { %v204_v32 = vadd.f32 %v203_v30, %v202_v28  ;;  %v216_v33 = vrot.slane %v215_v31, 2 }
 0x1b9   :  { %v205_v34 = vrot.slane %v204_v32, 1  ;;  %v217_v35 = vadd.f32 %v216_v33, %v215_v31 }
 0x1bb   :  { %v206_v36 = vadd.f32 %v205_v34, %v204_v32  ;;  %v218_v37 = vrot.slane %v217_v35, 1 }
 0x1bd   :  { %v208_v38 = vmul.f32 0.0625, %v206_v36  ;;  %v219_v39 = vadd.f32 %v218_v37, %v217_v35 }
 0x1bf   :  { %v220_v40 = vmul.f32 0.0625, %v219_v39  ;;  %v221_v41 = vmul.f32 %v208_v38, %v208_v38  ;;  %v223_v42 = vsub.f32 %v188_v18, %v208_v38  ;;  %v224_v43 = vsub.f32 %v193_v16, %v208_v38 }
 0x1c1   :  { %v222_v44 = vsub.f32 %v220_v40, %v221_v41 }
 0x1c3   :  { %v225_v45 = vadd.f32 1e-05, %v222_v44  ;;  %v4112_v44 = vld [vmem:[#allocation2 + $0x5] ss:$0 sm:$0xff] }
 0x1c5   :  { %4982 = vrsqrt.f32 %v225_v45 }
 0x1cf   :  { %v4983_v46 = vpop.eup %4982 }
 0x1d0   :  { %v227_v48 = vmul.f32 %v4983_v46, %v223_v42  ;;  %v228_v49 = vmul.f32 %v4983_v46, %v224_v43 }
 0x1d2   :  { %v233_v51 = vmul.f32 %v4105_v47, %v227_v48  ;;  %v234_v52 = vmul.f32 %v4105_v47, %v228_v49  ;;  %v4113_v47 = vld [vmem:[#allocation2 + $0x6] ss:$0 sm:$0xff] }
 0x1d4   :  { %v239_v53 = vadd.f32 %v4106_v50, %v233_v51  ;;  %v240_v54 = vadd.f32 %v4106_v50, %v234_v52 }
 0x1d6   :  { %v244_v55 = vmul.f32 0.70710677, %v240_v54  ;;  %v243_v56 = vmul.f32 0.70710677, %v239_v53  ;;  %v242_v59 = vmul.f32 0.5, %v240_v54  ;;  %v241_v61 = vmul.f32 0.5, %v239_v53 }
 0x1d8   :  { %4984 = verf.f32 %v244_v55 }
 0x1d9   :  { %4986 = verf.f32 %v243_v56 }
 0x1e2   :  { %v4985_v57 = vpop.eup %4984 }
 0x1e3   :  { %v4987_v58 = vpop.eup %4986  ;;  %v248_v60 = vadd.f32 1.0, %v4985_v57 }
 0x1e4   :  { %v247_v62 = vadd.f32 1.0, %v4987_v58 }
 0x1e5   :  { %v250_v63 = vmul.f32 %v248_v60, %v242_v59 }
 0x1e6   :  { %v249_v0 = vmul.f32 %v247_v62, %v241_v61  ;;  %v871_v62 = vld [vmem:[#allocation5 + $0x10] sm:$0xff] }
 0x1e7   :  { %4423 = vmatprep.subr.mxu1 %v871_v62 }
 0x1e8   :  { %4389 = vmatprep.mubr.msk.f32.mxu0 %vm114_vm0, %v249_v0  ;;  %v699_v0 = vld [vmem:[%s5776_s4 + $0x8] sm:$0xff]  ;;  %4424 = vmatpush3.msra.mxu1 %v871_v62 }
 0x1e9   :  { %4390 = vmatmul.mubr.msk.f32.vlgmr.msra.gmra.mrb[2].mxu0 %vm114_vm0, %v250_v63  ;;  %v698_v63 = vld [vmem:[%s5776_s4] sm:$0xff] }
 0x1ea   :  { %4396 = vmatprep.mubr.msk.f32.mxu0 %vm114_vm0, %v5396_v3  ;;  %4425 = vmatprep.mubr.msk.f32.mxu1 %vm706_vm1, %v698_v63 }
 0x1eb   :  { %4426 = vmatmul.mubr.msk.f32.vlgmr.msra.gmra.mrb[0].mxu1 %vm706_vm1, %v699_v0 }
 0x1ec   :  { %4437 = vmatprep.mubr.msk.f32.mxu1 %vm5260_vm2, %v5261_v7 }
 0x2bc   :  { %v4391_v1 = vpop.f32.mrb[2].mxu0 }
 0x2bd   :  { %v325_v2 = vpop.f32.mrb[3].mxu0 }
 0x2be   :  { %v4784_v5 = vpack.c.bf16 %v4391_v1, %v325_v2  ;;  %v1034_v1 = vld [vmem:[#allocation7] sm:$0xff]  ;;  %v1035_v2 = vld [vmem:[#allocation7 + $0x8] sm:$0xff] }
 0x2c0   :  { %4785 = vmatprep.subr.bf16.mxu0 %v4784_v5 }
 0x2c1   :  { %4787 = vmatpush3.bf16.msra.mxu0 %v4784_v5  ;;  %v5259_v5 = vmov 0.0|0.0  }
 0x2c2   :  { %4789 = vmatprep.subr.bf16.mxu0 %v4788_v9  ;;  %4796 = vmatprep.subr.bf16.mxu1 %v5259_v5 }
 0x2c4   :  { %4397 = vmatmul.mubr.msk.f32.vlgmr.msra.gmra.mrb[4].mxu0 %vm114_vm0, %v5409_v10 }
 0x2c5   :  { %4791 = vmatpush3.bf16.msra.mxu0 %v4788_v9  ;;  %v1041_v9 = vld [vmem:[#allocation7 + $0x28] sm:$0xff] }
 0x397   :  { %v4398_v12 = vpop.f32.mrb[4].mxu0 }
 0x398   :  { %v411_v13 = vadd.f32 %v4398_v12, %v4109_v11  ;;  %v405_v14 = vpop.f32.mrb[5].mxu0 }
 0x399   :  { %v406_v15 = vadd.f32 %v4109_v11, %v405_v14  ;;  %v5459_v11 = vpack.c.bf16 %v1041_v9, %v1040_v8 }
 0x39a   :  { %v417_v16 = vsel %vm114_vm0, %v411_v13, 0.0  ;;  %v427_v17 = vmul.f32 %v411_v13, %v411_v13 }
 0x39b   :  { %v416_v18 = vsel %vm114_vm0, %v406_v15, 0.0  ;;  %v426_v19 = vmul.f32 %v406_v15, %v406_v15 }
 0x39c   :  { %v429_v20 = vsel %vm114_vm0, %v427_v17, 0.0  ;;  %v418_v21 = vadd.f32 %v417_v16, %v416_v18  ;;  %v789_v16 = vld [vmem:[#allocation5 + $0x8] sm:$0xff]  ;;  %v953_v17 = vld [vmem:[#allocation5 + $0x18] sm:$0xff]  ;;  %v1037_v18 = vld [vmem:[#allocation7 + $0x10] sm:$0xff] }
 0x39d   :  { %v428_v22 = vsel %vm114_vm0, %v426_v19, 0.0  ;;  %v1038_v19 = vld [vmem:[#allocation7 + $0x18] sm:$0xff] }
 0x39e   :  { %v419_v23 = vrot.slane %v418_v21, 4  ;;  %v430_v24 = vadd.f32 %v429_v20, %v428_v22  ;;  %v5477_v20 = vpack.c.bf16 %v1038_v19, %v1037_v18 }
 0x3a0   :  { %v420_v25 = vadd.f32 %v419_v23, %v418_v21  ;;  %v431_v26 = vrot.slane %v430_v24, 4  ;;  %v1044_v21 = vld [vmem:[#allocation7 + $0x38] sm:$0xff]  ;;  %v4427_v23 = vpop.f32.mrb[0].mxu1 }
 0x3a2   :  { %v421_v27 = vrot.slane %v420_v25, 2  ;;  %v432_v28 = vadd.f32 %v431_v26, %v430_v24  ;;  %v943_v24 = vpop.f32.mrb[1].mxu1 }
 0x3a4   :  { %v422_v29 = vadd.f32 %v421_v27, %v420_v25  ;;  %v433_v30 = vrot.slane %v432_v28, 2  ;;  %v4129_v27 = vld [vmem:[#allocation2 + $0xc] ss:$0 sm:$0xff] }
 0x3a6   :  { %v423_v31 = vrot.slane %v422_v29, 1  ;;  %v434_v32 = vadd.f32 %v433_v30, %v432_v28  ;;  %v5497_v28 = vadd.f32 %v4427_v23, %v4129_v27 }
 0x3a8   :  { %v424_v33 = vadd.f32 %v423_v31, %v422_v29  ;;  %v435_v34 = vrot.slane %v434_v32, 1  ;;  %v4118_v31 = vld [vmem:[#allocation2 + $0x7] ss:$0 sm:$0xff] }
 0x3aa   :  { %v425_v35 = vmul.f32 0.0625, %v424_v33  ;;  %v436_v36 = vadd.f32 %v435_v34, %v434_v32 }
 0x3ac   :  { %v437_v37 = vmul.f32 0.0625, %v436_v36  ;;  %v438_v38 = vmul.f32 %v425_v35, %v425_v35  ;;  %v440_v39 = vsub.f32 %v406_v15, %v425_v35  ;;  %v441_v40 = vsub.f32 %v411_v13, %v425_v35  ;;  %v700_v15 = vld [vmem:[#allocation5] sm:$0xff]  ;;  %v4123_v36 = vld [vmem:[#allocation2 + $0xa] ss:$0 sm:$0xff] }
 0x3ae   :  { %v439_v41 = vsub.f32 %v437_v37, %v438_v38 }
 0x3b0   :  { %v442_v42 = vadd.f32 1e-05, %v439_v41 }
 0x3b2   :  { %4988 = vrsqrt.f32 %v442_v42 }
 0x3bc   :  { %v4989_v43 = vpop.eup %4988 }
 0x3bd   :  { %v444_v45 = vmul.f32 %v4989_v43, %v440_v39  ;;  %v445_v46 = vmul.f32 %v4989_v43, %v441_v40 }
 0x3bf   :  { %v450_v48 = vmul.f32 %v4112_v44, %v444_v45  ;;  %v451_v49 = vmul.f32 %v4112_v44, %v445_v46 }
 0x3c1   :  { %v456_v50 = vadd.f32 %v4113_v47, %v450_v48  ;;  %v457_v51 = vadd.f32 %v4113_v47, %v451_v49  ;;  %v4126_v48 = vld [vmem:[#allocation2 + $0xb] ss:$0 sm:$0xff] }
 0x3c3   :  { %v461_v52 = vmul.f32 0.70710677, %v457_v51  ;;  %v460_v53 = vmul.f32 0.70710677, %v456_v50  ;;  %v459_v56 = vmul.f32 0.5, %v457_v51  ;;  %v458_v58 = vmul.f32 0.5, %v456_v50 }
 0x3c5   :  { %4990 = verf.f32 %v461_v52 }
 0x3c6   :  { %4992 = verf.f32 %v460_v53 }
 0x3cf   :  { %v4991_v54 = vpop.eup %4990 }
 0x3d0   :  { %v4993_v55 = vpop.eup %4992  ;;  %v465_v57 = vadd.f32 1.0, %v4991_v54 }
 0x3d1   :  { %v464_v59 = vadd.f32 1.0, %v4993_v55 }
 0x3d2   :  { %v467_v60 = vmul.f32 %v465_v57, %v459_v56 }
 0x3d3   :  { %v466_v61 = vmul.f32 %v464_v59, %v458_v58  ;;  %v4132_v58 = vld [vmem:[#allocation2 + $0xd] ss:$0 sm:$0xff] }
 0x3d5   :  { %4403 = vmatprep.mubr.msk.f32.mxu0 %vm114_vm0, %v466_v61 }
 0x3d6   :  { %4404 = vmatmul.mubr.msk.f32.vlgmr.msra.gmra.mrb[6].mxu0 %vm114_vm0, %v467_v60 }
 0x3d7   :  { %4410 = vmatprep.mubr.msk.f32.mxu0 %vm114_vm0, %v5396_v3  ;;  %v5452_v3 = vpack.c.bf16 %v1035_v2, %v1034_v1 }
 0x3d9   :  { %4798 = vmatpush3.bf16.msra.mxu1 %v5452_v3 }
 0x3da   :  { %4802 = vmatprep.subr.bf16.mxu1 %v5259_v5 }
 0x3dc   :  { %4438 = vmatmul.mubr.f32.vlgmr.msra.gmra.mrb[2].mxu1 %v5261_v7 }
 0x3dd   :  { %4451 = vmatprep.mubr.msk.f32.mxu1 %vm5260_vm2, %v5261_v7  ;;  %4804 = vmatpush3.bf16.msra.mxu1 %v5459_v11 }
 0x3de   :  { %4808 = vmatprep.subr.bf16.mxu1 %v5259_v5 }
 0x3e0   :  { %4452 = vmatmul.mubr.f32.vlgmr.msra.gmra.mrb[4].mxu1 %v5261_v7 }
 0x3e1   :  { %4810 = vmatpush3.bf16.msra.mxu1 %v5452_v3  ;;  %4465 = vmatprep.mubr.msk.f32.mxu1 %vm5260_vm2, %v5261_v7 }
 0x3e2   :  { %4814 = vmatprep.subr.bf16.mxu1 %v5259_v5 }
 0x4a9   :  { %v4405_v12 = vpop.f32.mrb[6].mxu0 }
 0x4aa   :  { %v543_v13 = vpop.f32.mrb[7].mxu0 }
 0x4ab   :  { %v4792_v14 = vpack.c.bf16 %v4405_v12, %v543_v13  ;;  %v5524_v12 = vadd.f32 %v4129_v27, %v943_v24 }
 0x4ad   :  { %4793 = vmatprep.subr.bf16.mxu0 %v4792_v14 }
 0x4ae   :  { %4795 = vmatpush3.bf16.msra.mxu0 %v4792_v14 }
 0x4af   :  { %4413 = vmatprep.subr.mxu0 %v700_v15  ;;  %v1114_v25 = vpop.f32.mrb[2].mxu1 }
 0x4b0   :  { %v4439_v26 = vpop.f32.mrb[3].mxu1 }
 0x4b1   :  { %4411 = vmatmul.mubr.msk.f32.vlgmr.msra.gmra.mrb[8].mxu0 %vm114_vm0, %v5409_v10  ;;  %v1043_v10 = vld [vmem:[#allocation7 + $0x30] sm:$0xff] }
 0x4b2   :  { %4414 = vmatpush3.msra.mxu0 %v700_v15  ;;  %4415 = vmatprep.mubr.msk.f32.mxu0 %vm706_vm1, %v698_v63  ;;  %v5484_v22 = vpack.c.bf16 %v1044_v21, %v1043_v10 }
 0x4b3   :  { %4418 = vmatprep.subr.mxu0 %v789_v16  ;;  %v1256_v29 = vpop.f32.mrb[4].mxu1 }
 0x4b4   :  { %v4453_v30 = vpop.f32.mrb[5].mxu1  ;;  %v1260_v21 = vadd.f32 %v1256_v29, %v5524_v12 }
 0x4b5   :  { %4416 = vmatmul.mubr.msk.f32.vlgmr.msra.gmra.mrb[10].mxu0 %vm706_vm1, %v699_v0 }
 0x4b6   :  { %4419 = vmatpush3.msra.mxu0 %v789_v16  ;;  %4420 = vmatprep.mubr.msk.f32.mxu0 %vm706_vm1, %v698_v63 }
 0x4b7   :  { %4428 = vmatprep.subr.mxu0 %v953_v17 }
 0x4b9   :  { %4421 = vmatmul.mubr.msk.f32.vlgmr.msra.gmra.mrb[12].mxu0 %vm706_vm1, %v699_v0 }
 0x4ba   :  { %4429 = vmatpush3.msra.mxu0 %v953_v17  ;;  %4430 = vmatprep.mubr.msk.f32.mxu0 %vm706_vm1, %v698_v63 }
 0x4bb   :  { %4799 = vmatprep.subr.bf16.mxu0 %v5259_v5 }
 0x4bd   :  { %4431 = vmatmul.mubr.msk.f32.vlgmr.msra.gmra.mrb[14].mxu0 %vm706_vm1, %v699_v0 }
 0x4be   :  { %4801 = vmatpush3.bf16.msra.mxu0 %v5477_v20  ;;  %4444 = vmatprep.mubr.msk.f32.mxu0 %vm5260_vm2, %v5261_v7 }
 0x4bf   :  { %4805 = vmatprep.subr.bf16.mxu0 %v5259_v5 }
 0x4c1   :  { %4445 = vmatmul.mubr.f32.vlgmr.msra.gmra.mrb[16].mxu0 %v5261_v7 }
 0x4c2   :  { %4807 = vmatpush3.bf16.msra.mxu0 %v5484_v22  ;;  %4458 = vmatprep.mubr.msk.f32.mxu0 %vm5260_vm2, %v5261_v7 }
 0x4c3   :  { %4811 = vmatprep.subr.bf16.mxu0 %v5259_v5 }
 0x4c5   :  { %4459 = vmatmul.mubr.f32.vlgmr.msra.gmra.mrb[18].mxu0 %v5261_v7 }
 0x4c6   :  { %4813 = vmatpush3.bf16.msra.mxu0 %v5477_v20  ;;  %4472 = vmatprep.mubr.msk.f32.mxu0 %vm5260_vm2, %v5261_v7 }
 0x4c7   :  { %4817 = vmatprep.subr.bf16.mxu0 %v5259_v5 }
 0x584   :  { %v4412_v32 = vpop.f32.mrb[8].mxu0 }
 0x585   :  { %v5499_v33 = vadd.f32 %v4412_v32, %v4118_v31  ;;  %v623_v34 = vpop.f32.mrb[9].mxu0 }
 0x586   :  { %v5501_v35 = vadd.f32 %v4118_v31, %v623_v34 }
 0x587   :  { %v635_v37 = vsel %vm114_vm0, %v5499_v33, 0.0  ;;  %v645_v38 = vmul.f32 %v5499_v33, %v5499_v33 }
 0x588   :  { %v634_v39 = vsel %vm114_vm0, %v5501_v35, 0.0  ;;  %v644_v40 = vmul.f32 %v5501_v35, %v5501_v35  ;;  %v4417_v41 = vpop.f32.mrb[10].mxu0 }
 0x589   :  { %v647_v42 = vsel %vm114_vm0, %v645_v38, 0.0  ;;  %v636_v43 = vadd.f32 %v635_v37, %v634_v39  ;;  %v5512_v44 = vadd.f32 %v4417_v41, %v4123_v36  ;;  %v779_v45 = vpop.f32.mrb[11].mxu0 }
 0x58a   :  { %v646_v46 = vsel %vm114_vm0, %v644_v40, 0.0  ;;  %v5515_v47 = vadd.f32 %v4123_v36, %v779_v45 }
 0x58b   :  { %v637_v49 = vrot.slane %v636_v43, 4  ;;  %v648_v50 = vadd.f32 %v647_v42, %v646_v46 }
 0x58c   :  { %v1118_v51 = vadd.f32 %v1114_v25, %v5515_v47  ;;  %v4422_v52 = vpop.f32.mrb[12].mxu0 }
 0x58d   :  { %v638_v53 = vadd.f32 %v637_v49, %v636_v43  ;;  %v649_v54 = vrot.slane %v648_v50, 4  ;;  %v5518_v55 = vadd.f32 %v4422_v52, %v4126_v48  ;;  %v861_v56 = vpop.f32.mrb[13].mxu0  ;;  %v4121_v43 = vld [vmem:[#allocation2 + $0x8] ss:$0 sm:$0xff] }
 0x58e   :  { %v4135_v57 = vmul.f32 -1.442695, %v1118_v51  ;;  %v5522_v9 = vadd.f32 %v4126_v48, %v861_v56  ;;  %v4122_v48 = vld [vmem:[#allocation2 + $0x9] ss:$0 sm:$0xff] }
 0x58f   :  { %v639_v59 = vrot.slane %v638_v53, 2  ;;  %v650_v60 = vadd.f32 %v649_v54, %v648_v50 }
 0x590   :  { %4994 = vpow2.f32 %v4135_v57  ;;  %v4432_v61 = vpop.f32.mrb[14].mxu0 }
 0x591   :  { %v640_v62 = vadd.f32 %v639_v59, %v638_v53  ;;  %v651_v63 = vrot.slane %v650_v60, 2  ;;  %v5520_v0 = vadd.f32 %v4432_v61, %v4132_v58  ;;  %v1025_v1 = vpop.f32.mrb[15].mxu0 }
 0x592   :  { %v5530_v32 = vadd.f32 %v4132_v58, %v1025_v1 }
 0x593   :  { %v641_v2 = vrot.slane %v640_v62, 1  ;;  %v652_v8 = vadd.f32 %v651_v63, %v650_v60 }
 0x594   :  { %v1185_v13 = vpop.f32.mrb[16].mxu0 }
 0x595   :  { %v642_v14 = vadd.f32 %v641_v2, %v640_v62  ;;  %v653_v15 = vrot.slane %v652_v8, 1  ;;  %v1189_v16 = vadd.f32 %v1185_v13, %v5522_v9  ;;  %v4446_v17 = vpop.f32.mrb[17].mxu0 }
 0x597   :  { %v643_v18 = vmul.f32 0.0625, %v642_v14  ;;  %v654_v19 = vadd.f32 %v653_v15, %v652_v8  ;;  %v4136_v10 = vmul.f32 -1.442695, %v1189_v16 }
 0x598   :  { %v1327_v23 = vpop.f32.mrb[18].mxu0 }
 0x599   :  { %v655_v25 = vmul.f32 0.0625, %v654_v19  ;;  %v656_v26 = vmul.f32 %v643_v18, %v643_v18  ;;  %v658_v30 = vsub.f32 %v5501_v35, %v643_v18  ;;  %v659_v31 = vsub.f32 %v5499_v33, %v643_v18  ;;  %v4460_v24 = vpop.f32.mrb[19].mxu0 }
 0x59a   :  { %v4995_v27 = vpop.eup %4994  ;;  %4996 = vpow2.f32 %v4136_v10  ;;  %v1331_v37 = vadd.f32 %v1327_v23, %v5530_v32 }
 0x59b   :  { %v657_v34 = vsub.f32 %v655_v25, %v656_v26  ;;  %v1335_v36 = vadd.f32 1.0, %v4995_v27  ;;  %4998 = vtanh.f32 %v1260_v21 }
 0x59c   :  { %v4137_v29 = vmul.f32 -1.442695, %v1331_v37 }
 0x59d   :  { %v660_v38 = vadd.f32 1e-05, %v657_v34  ;;  %5000 = vrcp.f32 %v1335_v36 }
 0x59f   :  { %5002 = vrsqrt.f32 %v660_v38 }
 0x5a0   :  { %5004 = vpow2.f32 %v4137_v29 }
 0x5a4   :  { %v4997_v39 = vpop.eup %4996 }
 0x5a5   :  { %v1341_v40 = vadd.f32 1.0, %v4997_v39  ;;  %v4999_v35 = vpop.eup %4998 }
 0x5a7   :  { %v5001_v41 = vpop.eup %5000  ;;  %5006 = vrcp.f32 %v1341_v40 }
 0x5a8   :  { %v1346_v33 = vmul.f32 %v5001_v41, %v4999_v35 }
 0x5a9   :  { %v5003_v42 = vpop.eup %5002 }
 0x5aa   :  { %v662_v45 = vmul.f32 %v5003_v42, %v658_v30  ;;  %v663_v46 = vmul.f32 %v5003_v42, %v659_v31  ;;  %v5005_v51 = vpop.eup %5004 }
 0x5ab   :  { %v1351_v58 = vadd.f32 1.0, %v5005_v51 }
 0x5ac   :  { %v668_v49 = vmul.f32 %v4121_v43, %v662_v45  ;;  %v669_v50 = vmul.f32 %v4121_v43, %v663_v46 }
 0x5ae   :  { %v674_v52 = vadd.f32 %v4122_v48, %v668_v49  ;;  %v675_v53 = vadd.f32 %v4122_v48, %v669_v50 }
 0x5b0   :  { %v678_v54 = vmul.f32 0.70710677, %v674_v52  ;;  %v679_v56 = vmul.f32 0.70710677, %v675_v53  ;;  %v676_v63 = vmul.f32 0.5, %v674_v52  ;;  %v677_v2 = vmul.f32 0.5, %v675_v53 }
 0x5b1   :  { %v5007_v57 = vpop.eup %5006 }
 0x5b2   :  { %5008 = verf.f32 %v678_v54  ;;  %v1344_v59 = vmul.f32 0.0, %v5007_v57 }
 0x5b3   :  { %5010 = verf.f32 %v679_v56 }
 0x5b4   :  { %v5533_v60 = vadd.f32 %v1346_v33, %v1344_v59  ;;  %5012 = vrcp.f32 %v1351_v58 }
 0x5b6   :  { %5014 = vtanh.f32 %v5533_v60  ;;  %v1668_v52 = vrot.slane %v5533_v60, 6 }
 0x5bc   :  { %v5009_v61 = vpop.eup %5008 }
 0x5bd   :  { %v5011_v62 = vpop.eup %5010  ;;  %v682_v1 = vadd.f32 1.0, %v5009_v61 }
 0x5be   :  { %v683_v8 = vadd.f32 1.0, %v5011_v62  ;;  %v5013_v13 = vpop.eup %5012 }
 0x5bf   :  { %v684_v14 = vmul.f32 %v682_v1, %v676_v63 }
 0x5c0   :  { %v5015_v15 = vpop.eup %5014  ;;  %v685_v16 = vmul.f32 %v683_v8, %v677_v2 }
 0x5c1   :  { %v686_v17 = vadd.f32 %v684_v14, %v5400_v4  ;;  %v1355_v18 = vmul.f32 %v5015_v15, %v5013_v13 }
 0x5c2   :  { %v687_v19 = vadd.f32 %v685_v16, %v5402_v6 }
 0x5c3   :  { %v688_v10 = vsel %vm114_vm0, %v686_v17, 0.0  ;;  %4466 = vmatmul.mubr.msk.f32.vlgmr.msra.gmra.mrb[6].mxu1 %vm114_vm0, %v1355_v18  ;;  %4473 = vmatmul.mubr.msk.f32.vlgmr.msra.gmra.mrb[20].mxu0 %vm114_vm0, %v1355_v18 }
 0x5c4   :  { %4816 = vmatpush3.bf16.msra.mxu1 %v5459_v11  ;;  %4819 = vmatpush3.bf16.msra.mxu0 %v5484_v22  ;;  %v689_v21 = vsel %vm114_vm0, %v687_v19, 0.0 }
 0x5c5   :  { %4479 = vmatprep.mubr.msk.f32.mxu1 %vm5260_vm2, %v5261_v7  ;;  %4486 = vmatprep.mubr.msk.f32.mxu0 %vm5260_vm2, %v5261_v7  ;;  %v5548_v4 = vadd.f32 %v689_v21, %v688_v10 }
 0x5c6   :  { %4820 = vmatprep.subr.bf16.mxu1 %v5259_v5  ;;  %4823 = vmatprep.subr.bf16.mxu0 %v5259_v5 }
 0x5c7   :  { %4480 = vmatmul.mubr.msk.f32.vlgmr.msra.gmra.mrb[8].mxu1 %vm114_vm0, %v1355_v18  ;;  %4487 = vmatmul.mubr.msk.f32.vlgmr.msra.gmra.mrb[22].mxu0 %vm114_vm0, %v1355_v18 }
 0x5c8   :  { %4822 = vmatpush3.bf16.msra.mxu1 %v5452_v3  ;;  %4825 = vmatpush3.bf16.msra.mxu0 %v5477_v20 }
 0x5c9   :  { %4493 = vmatprep.mubr.msk.f32.mxu1 %vm5260_vm2, %v5261_v7  ;;  %4500 = vmatprep.mubr.msk.f32.mxu0 %vm5260_vm2, %v5261_v7 }
 0x5ca   :  { %4826 = vmatprep.subr.bf16.mxu1 %v5259_v5  ;;  %4829 = vmatprep.subr.bf16.mxu0 %v5259_v5 }
 0x696   :  { %v1425_v6 = vpop.f32.mrb[6].mxu1  ;;  %v1499_v23 = vpop.f32.mrb[20].mxu0 }
 0x697   :  { %v1430_v25 = vrot.slane %v1425_v6, 6  ;;  %v1504_v26 = vrot.slane %v1499_v23, 6  ;;  %v4467_v30 = vpop.f32.mrb[7].mxu1  ;;  %v4474_v31 = vpop.f32.mrb[21].mxu0 }
 0x699   :  { %v1432_v24 = vadd.f32 %v1430_v25, %v5515_v47  ;;  %v1506_v27 = vadd.f32 %v1504_v26, %v5522_v9 }
 0x69a   :  { %v1573_v34 = vpop.f32.mrb[8].mxu1  ;;  %v1647_v36 = vpop.f32.mrb[22].mxu0 }
 0x69b   :  { %v4142_v37 = vmul.f32 -1.442695, %v1432_v24  ;;  %v4143_v38 = vmul.f32 -1.442695, %v1506_v27  ;;  %v1652_v29 = vrot.slane %v1647_v36, 6  ;;  %v4481_v39 = vpop.f32.mrb[9].mxu1 }
 0x69c   :  { %v4488_v40 = vpop.f32.mrb[23].mxu0  ;;  %v1578_v41 = vrot.slane %v1573_v34, 6 }
 0x69d   :  { %5016 = vpow2.f32 %v4142_v37  ;;  %v1654_v35 = vadd.f32 %v1652_v29, %v5530_v32 }
 0x69e   :  { %5018 = vpow2.f32 %v4143_v38  ;;  %v1580_v42 = vadd.f32 %v1578_v41, %v5524_v12 }
 0x69f   :  { %v4144_v33 = vmul.f32 -1.442695, %v1654_v35 }
 0x6a1   :  { %5020 = vpow2.f32 %v4144_v33 }
 0x6a2   :  { %5022 = vtanh.f32 %v1580_v42 }
 0x6a7   :  { %v5017_v43 = vpop.eup %5016 }
 0x6a8   :  { %v5019_v45 = vpop.eup %5018  ;;  %v1658_v46 = vadd.f32 1.0, %v5017_v43 }
 0x6a9   :  { %v1664_v48 = vadd.f32 1.0, %v5019_v45 }
 0x6aa   :  { %5024 = vrcp.f32 %v1658_v46 }
 0x6ab   :  { %5026 = vrcp.f32 %v1664_v48  ;;  %v5021_v49 = vpop.eup %5020 }
 0x6ac   :  { %v5023_v50 = vpop.eup %5022  ;;  %v1677_v56 = vadd.f32 1.0, %v5021_v49 }
 0x6ae   :  { %5028 = vrcp.f32 %v1677_v56 }
 0x6b4   :  { %v5025_v51 = vpop.eup %5024 }
 0x6b5   :  { %v5027_v53 = vpop.eup %5026  ;;  %v1672_v54 = vmul.f32 %v5025_v51, %v5023_v50 }
 0x6b6   :  { %v1670_v57 = vmul.f32 %v5027_v53, %v1668_v52 }
 0x6b8   :  { %v1673_v58 = vadd.f32 %v1672_v54, %v1670_v57  ;;  %v5029_v59 = vpop.eup %5028 }
 0x6ba   :  { %5030 = vtanh.f32 %v1673_v58  ;;  %v1995_v39 = vrot.slane %v1673_v58, 6 }
 0x6c4   :  { %v5031_v61 = vpop.eup %5030 }
 0x6c5   :  { %v1681_v62 = vmul.f32 %v5031_v61, %v5029_v59 }
 0x6c7   :  { %v1683_v63 = vrot.slane %v1681_v62, 2 }
 0x6c9   :  { %4494 = vmatmul.mubr.msk.f32.vlgmr.msra.gmra.mrb[10].mxu1 %vm114_vm0, %v1683_v63  ;;  %4501 = vmatmul.mubr.msk.f32.vlgmr.msra.gmra.mrb[24].mxu0 %vm114_vm0, %v1683_v63 }
 0x6ca   :  { %4828 = vmatpush3.bf16.msra.mxu1 %v5459_v11  ;;  %4831 = vmatpush3.bf16.msra.mxu0 %v5484_v22 }
 0x6cb   :  { %4507 = vmatprep.mubr.msk.f32.mxu1 %vm5260_vm2, %v5261_v7  ;;  %4514 = vmatprep.mubr.msk.f32.mxu0 %vm5260_vm2, %v5261_v7 }
 0x6cc   :  { %4832 = vmatprep.subr.bf16.mxu1 %v5259_v5  ;;  %4835 = vmatprep.subr.bf16.mxu0 %v5259_v5 }
 0x6cd   :  { %4508 = vmatmul.mubr.msk.f32.vlgmr.msra.gmra.mrb[12].mxu1 %vm114_vm0, %v1683_v63  ;;  %4515 = vmatmul.mubr.msk.f32.vlgmr.msra.gmra.mrb[26].mxu0 %vm114_vm0, %v1683_v63 }
 0x6ce   :  { %4834 = vmatpush3.bf16.msra.mxu1 %v5452_v3  ;;  %4837 = vmatpush3.bf16.msra.mxu0 %v5477_v20 }
 0x6cf   :  { %4521 = vmatprep.mubr.msk.f32.mxu1 %vm5260_vm2, %v5261_v7  ;;  %4528 = vmatprep.mubr.msk.f32.mxu0 %vm5260_vm2, %v5261_v7 }
 0x6d0   :  { %4838 = vmatprep.subr.bf16.mxu1 %v5259_v5  ;;  %4841 = vmatprep.subr.bf16.mxu0 %v5259_v5 }
 0x79c   :  { %v1752_v60 = vpop.f32.mrb[10].mxu1  ;;  %v1826_v1 = vpop.f32.mrb[24].mxu0 }
 0x79d   :  { %v1757_v2 = vrot.slane %v1752_v60, 4  ;;  %v1831_v8 = vrot.slane %v1826_v1, 4  ;;  %v4495_v13 = vpop.f32.mrb[11].mxu1  ;;  %v4502_v14 = vpop.f32.mrb[25].mxu0 }
 0x79f   :  { %v1759_v15 = vadd.f32 %v1757_v2, %v5515_v47  ;;  %v1833_v16 = vadd.f32 %v1831_v8, %v5522_v9 }
 0x7a0   :  { %v1900_v17 = vpop.f32.mrb[12].mxu1  ;;  %v1974_v18 = vpop.f32.mrb[26].mxu0 }
 0x7a1   :  { %v4149_v19 = vmul.f32 -1.442695, %v1759_v15  ;;  %v4150_v10 = vmul.f32 -1.442695, %v1833_v16  ;;  %v1979_v21 = vrot.slane %v1974_v18, 4  ;;  %v4509_v6 = vpop.f32.mrb[13].mxu1 }
 0x7a2   :  { %v4516_v23 = vpop.f32.mrb[27].mxu0  ;;  %v1905_v26 = vrot.slane %v1900_v17, 4 }
 0x7a3   :  { %5032 = vpow2.f32 %v4149_v19  ;;  %v1981_v25 = vadd.f32 %v1979_v21, %v5530_v32 }
 0x7a4   :  { %5034 = vpow2.f32 %v4150_v10  ;;  %v1907_v31 = vadd.f32 %v1905_v26, %v5524_v12 }
 0x7a5   :  { %v4151_v30 = vmul.f32 -1.442695, %v1981_v25 }
 0x7a7   :  { %5036 = vpow2.f32 %v4151_v30 }
 0x7a8   :  { %5038 = vtanh.f32 %v1907_v31 }
 0x7ad   :  { %v5033_v24 = vpop.eup %5032 }
 0x7ae   :  { %v5035_v27 = vpop.eup %5034  ;;  %v1985_v34 = vadd.f32 1.0, %v5033_v24 }
 0x7af   :  { %v1991_v36 = vadd.f32 1.0, %v5035_v27 }
 0x7b0   :  { %5040 = vrcp.f32 %v1985_v34 }
 0x7b1   :  { %5042 = vrcp.f32 %v1991_v36  ;;  %v5037_v37 = vpop.eup %5036 }
 0x7b2   :  { %v5039_v38 = vpop.eup %5038  ;;  %v2004_v41 = vadd.f32 1.0, %v5037_v37 }
 0x7b4   :  { %5044 = vrcp.f32 %v2004_v41 }
 0x7ba   :  { %v5041_v29 = vpop.eup %5040 }
 0x7bb   :  { %v5043_v40 = vpop.eup %5042  ;;  %v1999_v35 = vmul.f32 %v5041_v29, %v5039_v38 }
 0x7bc   :  { %v1997_v33 = vmul.f32 %v5043_v40, %v1995_v39 }
 0x7be   :  { %v2000_v42 = vadd.f32 %v1999_v35, %v1997_v33  ;;  %v5045_v43 = vpop.eup %5044 }
 0x7c0   :  { %5046 = vtanh.f32 %v2000_v42  ;;  %v2322_v10 = vrot.slane %v2000_v42, 6 }
 0x7ca   :  { %v5047_v45 = vpop.eup %5046 }
 0x7cb   :  { %v2008_v46 = vmul.f32 %v5047_v45, %v5045_v43 }
 0x7cd   :  { %v2010_v48 = vrot.slane %v2008_v46, 4 }
 0x7cf   :  { %4522 = vmatmul.mubr.msk.f32.vlgmr.msra.gmra.mrb[14].mxu1 %vm114_vm0, %v2010_v48  ;;  %4529 = vmatmul.mubr.msk.f32.vlgmr.msra.gmra.mrb[28].mxu0 %vm114_vm0, %v2010_v48 }
 0x7d0   :  { %4840 = vmatpush3.bf16.msra.mxu1 %v5459_v11  ;;  %4843 = vmatpush3.bf16.msra.mxu0 %v5484_v22 }
 0x7d1   :  { %4535 = vmatprep.mubr.msk.f32.mxu1 %vm5260_vm2, %v5261_v7  ;;  %4542 = vmatprep.mubr.msk.f32.mxu0 %vm5260_vm2, %v5261_v7 }
 0x7d2   :  { %4844 = vmatprep.subr.bf16.mxu1 %v5259_v5  ;;  %4847 = vmatprep.subr.bf16.mxu0 %v5259_v5 }
 0x7d3   :  { %4536 = vmatmul.mubr.msk.f32.vlgmr.msra.gmra.mrb[16].mxu1 %vm114_vm0, %v2010_v48  ;;  %4543 = vmatmul.mubr.msk.f32.vlgmr.msra.gmra.mrb[30].mxu0 %vm114_vm0, %v2010_v48 }
 0x7d4   :  { %4846 = vmatpush3.bf16.msra.mxu1 %v5452_v3  ;;  %4849 = vmatpush3.bf16.msra.mxu0 %v5477_v20 }
 0x7d5   :  { %4549 = vmatprep.mubr.msk.f32.mxu1 %vm5260_vm2, %v5261_v7  ;;  %4556 = vmatprep.mubr.msk.f32.mxu0 %vm5260_vm2, %v5261_v7 }
 0x7d6   :  { %4850 = vmatprep.subr.bf16.mxu1 %v5259_v5  ;;  %4853 = vmatprep.subr.bf16.mxu0 %v5259_v5 }
 0x8a2   :  { %v2079_v49 = vpop.f32.mrb[14].mxu1  ;;  %v2153_v50 = vpop.f32.mrb[28].mxu0 }
 0x8a3   :  { %v2084_v51 = vrot.slane %v2079_v49, 2  ;;  %v2158_v52 = vrot.slane %v2153_v50, 2  ;;  %v4523_v53 = vpop.f32.mrb[15].mxu1  ;;  %v4530_v54 = vpop.f32.mrb[29].mxu0 }
 0x8a5   :  { %v2086_v56 = vadd.f32 %v2084_v51, %v5515_v47  ;;  %v2160_v57 = vadd.f32 %v2158_v52, %v5522_v9 }
 0x8a6   :  { %v2227_v58 = vpop.f32.mrb[16].mxu1  ;;  %v2301_v59 = vpop.f32.mrb[30].mxu0 }
 0x8a7   :  { %v4156_v61 = vmul.f32 -1.442695, %v2086_v56  ;;  %v4157_v62 = vmul.f32 -1.442695, %v2160_v57  ;;  %v2306_v63 = vrot.slane %v2301_v59, 2  ;;  %v4537_v60 = vpop.f32.mrb[17].mxu1 }
 0x8a8   :  { %v4544_v1 = vpop.f32.mrb[31].mxu0  ;;  %v2232_v8 = vrot.slane %v2227_v58, 2 }
 0x8a9   :  { %5048 = vpow2.f32 %v4156_v61  ;;  %v2308_v2 = vadd.f32 %v2306_v63, %v5530_v32 }
 0x8aa   :  { %5050 = vpow2.f32 %v4157_v62  ;;  %v2234_v14 = vadd.f32 %v2232_v8, %v5524_v12 }
 0x8ab   :  { %v4158_v13 = vmul.f32 -1.442695, %v2308_v2 }
 0x8ad   :  { %5052 = vpow2.f32 %v4158_v13 }
 0x8ae   :  { %5054 = vtanh.f32 %v2234_v14 }
 0x8b3   :  { %v5049_v15 = vpop.eup %5048 }
 0x8b4   :  { %v5051_v16 = vpop.eup %5050  ;;  %v2312_v47 = vadd.f32 1.0, %v5049_v15 }
 0x8b5   :  { %v2318_v9 = vadd.f32 1.0, %v5051_v16 }
 0x8b6   :  { %5056 = vrcp.f32 %v2312_v47 }
 0x8b7   :  { %5058 = vrcp.f32 %v2318_v9  ;;  %v5053_v17 = vpop.eup %5052 }
 0x8b8   :  { %v5055_v18 = vpop.eup %5054  ;;  %v2331_v23 = vadd.f32 1.0, %v5053_v17 }
 0x8ba   :  { %5060 = vrcp.f32 %v2331_v23 }
 0x8c0   :  { %v5057_v19 = vpop.eup %5056 }
 0x8c1   :  { %v5059_v21 = vpop.eup %5058  ;;  %v2326_v6 = vmul.f32 %v5057_v19, %v5055_v18 }
 0x8c2   :  { %v2324_v32 = vmul.f32 %v5059_v21, %v2322_v10 }
 0x8c4   :  { %v2327_v25 = vadd.f32 %v2326_v6, %v2324_v32  ;;  %v5061_v12 = vpop.eup %5060 }
 0x8c6   :  { %5062 = vtanh.f32 %v2327_v25  ;;  %v2637_v54 = vrot.slane %v2327_v25, 6 }
 0x8d0   :  { %v5063_v26 = vpop.eup %5062 }
 0x8d1   :  { %v2335_v30 = vmul.f32 %v5063_v26, %v5061_v12 }
 0x8d3   :  { %v2337_v31 = vrot.slane %v2335_v30, 6 }
 0x8d5   :  { %4550 = vmatmul.mubr.msk.f32.vlgmr.msra.gmra.mrb[18].mxu1 %vm114_vm0, %v2337_v31  ;;  %4557 = vmatmul.mubr.msk.f32.vlgmr.msra.gmra.mrb[32].mxu0 %vm114_vm0, %v2337_v31 }
 0x8d6   :  { %4852 = vmatpush3.bf16.msra.mxu1 %v5459_v11  ;;  %4855 = vmatpush3.bf16.msra.mxu0 %v5484_v22 }
 0x8d7   :  { %4563 = vmatprep.mubr.msk.f32.mxu1 %vm5260_vm2, %v5261_v7  ;;  %4570 = vmatprep.mubr.msk.f32.mxu0 %vm5260_vm2, %v5261_v7 }
 0x8d8   :  { %4856 = vmatprep.subr.bf16.mxu1 %v5259_v5  ;;  %4859 = vmatprep.subr.bf16.mxu0 %v5259_v5 }
 0x8d9   :  { %4564 = vmatmul.mubr.msk.f32.vlgmr.msra.gmra.mrb[20].mxu1 %vm114_vm0, %v2337_v31  ;;  %4571 = vmatmul.mubr.msk.f32.vlgmr.msra.gmra.mrb[34].mxu0 %vm114_vm0, %v2337_v31 }
 0x8da   :  { %4858 = vmatpush3.bf16.msra.mxu1 %v5452_v3  ;;  %4861 = vmatpush3.bf16.msra.mxu0 %v5477_v20 }
 0x8db   :  { %4577 = vmatprep.mubr.msk.f32.mxu1 %vm5260_vm2, %v5261_v7  ;;  %4584 = vmatprep.mubr.msk.f32.mxu0 %vm5260_vm2, %v5261_v7 }
 0x8dc   :  { %4862 = vmatprep.subr.bf16.mxu1 %v5259_v5  ;;  %4865 = vmatprep.subr.bf16.mxu0 %v5259_v5 }
 0x9a8   :  { %v2406_v24 = vpop.f32.mrb[18].mxu1  ;;  %v2477_v27 = vpop.f32.mrb[32].mxu0 }
 0x9a9   :  { %v2410_v34 = vadd.f32 %v2406_v24, %v5512_v44  ;;  %v2481_v36 = vadd.f32 %v2477_v27, %v5518_v55  ;;  %v4551_v37 = vpop.f32.mrb[19].mxu1  ;;  %v4558_v38 = vpop.f32.mrb[33].mxu0 }
 0x9ab   :  { %v4163_v29 = vmul.f32 -1.442695, %v2410_v34  ;;  %v4164_v39 = vmul.f32 -1.442695, %v2481_v36 }
 0x9ac   :  { %v2548_v40 = vpop.f32.mrb[20].mxu1  ;;  %v2619_v35 = vpop.f32.mrb[34].mxu0 }
 0x9ad   :  { %5064 = vpow2.f32 %v4163_v29  ;;  %v4565_v41 = vpop.f32.mrb[21].mxu1  ;;  %v4572_v33 = vpop.f32.mrb[35].mxu0  ;;  %v2623_v42 = vadd.f32 %v2619_v35, %v5520_v0  ;;  %v2552_v45 = vadd.f32 %v2548_v40, %v5497_v28 }
 0x9ae   :  { %5066 = vpow2.f32 %v4164_v39 }
 0x9af   :  { %v4165_v43 = vmul.f32 -1.442695, %v2623_v42 }
 0x9b1   :  { %5068 = vpow2.f32 %v4165_v43 }
 0x9b2   :  { %5070 = vtanh.f32 %v2552_v45 }
 0x9b7   :  { %v5065_v46 = vpop.eup %5064 }
 0x9b8   :  { %v5067_v48 = vpop.eup %5066  ;;  %v2627_v49 = vadd.f32 1.0, %v5065_v46 }
 0x9b9   :  { %v2633_v50 = vadd.f32 1.0, %v5067_v48 }
 0x9ba   :  { %5072 = vrcp.f32 %v2627_v49 }
 0x9bb   :  { %5074 = vrcp.f32 %v2633_v50  ;;  %v5069_v51 = vpop.eup %5068 }
 0x9bc   :  { %v5071_v52 = vpop.eup %5070  ;;  %v2646_v58 = vadd.f32 1.0, %v5069_v51 }
 0x9be   :  { %5076 = vrcp.f32 %v2646_v58 }
 0x9c4   :  { %v5073_v53 = vpop.eup %5072 }
 0x9c5   :  { %v5075_v56 = vpop.eup %5074  ;;  %v2641_v57 = vmul.f32 %v5073_v53, %v5071_v52 }
 0x9c6   :  { %v2639_v59 = vmul.f32 %v5075_v56, %v2637_v54 }
 0x9c8   :  { %v2642_v61 = vadd.f32 %v2641_v57, %v2639_v59  ;;  %v5077_v62 = vpop.eup %5076 }
 0x9ca   :  { %5078 = vtanh.f32 %v2642_v61  ;;  %v2963_v37 = vrot.slane %v2642_v61, 6 }
 0x9d4   :  { %v5079_v63 = vpop.eup %5078 }
 0x9d5   :  { %v2650_v60 = vmul.f32 %v5079_v63, %v5077_v62 }
 0x9d7   :  { %4578 = vmatmul.mubr.msk.f32.vlgmr.msra.gmra.mrb[22].mxu1 %vm114_vm0, %v2650_v60  ;;  %4585 = vmatmul.mubr.msk.f32.vlgmr.msra.gmra.mrb[36].mxu0 %vm114_vm0, %v2650_v60 }
 0x9d8   :  { %4864 = vmatpush3.bf16.msra.mxu1 %v5459_v11  ;;  %4867 = vmatpush3.bf16.msra.mxu0 %v5484_v22 }
 0x9d9   :  { %4591 = vmatprep.mubr.msk.f32.mxu1 %vm5260_vm2, %v5261_v7  ;;  %4598 = vmatprep.mubr.msk.f32.mxu0 %vm5260_vm2, %v5261_v7 }
 0x9da   :  { %4868 = vmatprep.subr.bf16.mxu1 %v5259_v5  ;;  %4871 = vmatprep.subr.bf16.mxu0 %v5259_v5 }
 0x9db   :  { %4592 = vmatmul.mubr.msk.f32.vlgmr.msra.gmra.mrb[24].mxu1 %vm114_vm0, %v2650_v60  ;;  %4599 = vmatmul.mubr.msk.f32.vlgmr.msra.gmra.mrb[38].mxu0 %vm114_vm0, %v2650_v60 }
 0x9dc   :  { %4870 = vmatpush3.bf16.msra.mxu1 %v5452_v3  ;;  %4873 = vmatpush3.bf16.msra.mxu0 %v5477_v20 }
 0x9dd   :  { %4605 = vmatprep.mubr.msk.f32.mxu1 %vm5260_vm2, %v5261_v7  ;;  %4612 = vmatprep.mubr.msk.f32.mxu0 %vm5260_vm2, %v5261_v7 }
 0x9de   :  { %4874 = vmatprep.subr.bf16.mxu1 %v5259_v5  ;;  %4877 = vmatprep.subr.bf16.mxu0 %v5259_v5 }
 0xaaa   :  { %v2720_v1 = vpop.f32.mrb[22].mxu1  ;;  %v2794_v2 = vpop.f32.mrb[36].mxu0 }
 0xaab   :  { %v2725_v8 = vrot.slane %v2720_v1, 6  ;;  %v2799_v13 = vrot.slane %v2794_v2, 6  ;;  %v4579_v14 = vpop.f32.mrb[23].mxu1  ;;  %v4586_v15 = vpop.f32.mrb[37].mxu0 }
 0xaad   :  { %v2727_v16 = vadd.f32 %v2725_v8, %v5512_v44  ;;  %v2801_v47 = vadd.f32 %v2799_v13, %v5518_v55 }
 0xaae   :  { %v2868_v9 = vpop.f32.mrb[24].mxu1  ;;  %v2942_v17 = vpop.f32.mrb[38].mxu0 }
 0xaaf   :  { %v4170_v18 = vmul.f32 -1.442695, %v2727_v16  ;;  %v4171_v19 = vmul.f32 -1.442695, %v2801_v47  ;;  %v2947_v10 = vrot.slane %v2942_v17, 6  ;;  %v4593_v21 = vpop.f32.mrb[25].mxu1 }
 0xab0   :  { %v4600_v6 = vpop.f32.mrb[39].mxu0  ;;  %v2873_v32 = vrot.slane %v2868_v9, 6 }
 0xab1   :  { %5080 = vpow2.f32 %v4170_v18  ;;  %v2949_v23 = vadd.f32 %v2947_v10, %v5520_v0  ;;  %v691_v10 = vrot.slane %v5548_v4, 4 }
 0xab2   :  { %5082 = vpow2.f32 %v4171_v19  ;;  %v2875_v12 = vadd.f32 %v2873_v32, %v5497_v28 }
 0xab3   :  { %v4172_v25 = vmul.f32 -1.442695, %v2949_v23  ;;  %v692_v6 = vadd.f32 %v691_v10, %v5548_v4 }
 0xab5   :  { %5084 = vpow2.f32 %v4172_v25  ;;  %v693_v23 = vrot.slane %v692_v6, 2 }
 0xab6   :  { %5086 = vtanh.f32 %v2875_v12 }
 0xab7   :  { %v694_v25 = vadd.f32 %v693_v23, %v692_v6 }
 0xabb   :  { %v5081_v26 = vpop.eup %5080 }
 0xabc   :  { %v5083_v30 = vpop.eup %5082  ;;  %v2953_v31 = vadd.f32 1.0, %v5081_v26 }
 0xabd   :  { %v2959_v24 = vadd.f32 1.0, %v5083_v30 }
 0xabe   :  { %5088 = vrcp.f32 %v2953_v31  ;;  %v3631_v31 = vld [vmem:[#allocation8] sm:$0xff] }
 0xabf   :  { %5090 = vrcp.f32 %v2959_v24  ;;  %v5085_v27 = vpop.eup %5084  ;;  %v3632_v24 = vld [vmem:[#allocation8 + $0x8] sm:$0xff] }
 0xac0   :  { %v5087_v34 = vpop.eup %5086  ;;  %v2972_v39 = vadd.f32 1.0, %v5085_v27  ;;  %v695_v27 = vrot.slane %v694_v25, 1 }
 0xac2   :  { %5092 = vrcp.f32 %v2972_v39  ;;  %v696_v4 = vadd.f32 %v695_v27, %v694_v25  ;;  %v3800_v39 = vld [vmem:[#allocation8 + $0x90] sm:$0xff]  ;;  %v3805_v25 = vld [vmem:[#allocation8 + $0xb8] sm:$0xff] }
 0xac8   :  { %v5089_v36 = vpop.eup %5088 }
 0xac9   :  { %v5091_v38 = vpop.eup %5090  ;;  %v2967_v29 = vmul.f32 %v5089_v36, %v5087_v34  ;;  %v4893_v34 = vpack.c.bf16 %v3632_v24, %v3631_v31  ;;  %v3634_v36 = vld [vmem:[#allocation8 + $0x18] sm:$0xff]  ;;  %v3808_v31 = vld [vmem:[#allocation8 + $0xd0] sm:$0xff] }
 0xaca   :  { %v2965_v40 = vmul.f32 %v5091_v38, %v2963_v37  ;;  %v3798_v38 = vld [vmem:[#allocation8 + $0x80] sm:$0xff]  ;;  %v3809_v24 = vld [vmem:[#allocation8 + $0xd8] sm:$0xff] }
 0xacb   :  { %v4914_v27 = vpack.c.bf16 %v3809_v24, %v3808_v31 }
 0xacc   :  { %v2968_v35 = vadd.f32 %v2967_v29, %v2965_v40  ;;  %v5093_v41 = vpop.eup %5092  ;;  %v3799_v29 = vld [vmem:[#allocation8 + $0x88] sm:$0xff] }
 0xacd   :  { %v4899_v40 = vpack.c.bf16 %v3799_v29, %v3798_v38  ;;  %v3895_v38 = vld [vmem:[#allocation8 + $0x100] sm:$0xff]  ;;  %v3896_v29 = vld [vmem:[#allocation8 + $0x108] sm:$0xff] }
 0xace   :  { %5094 = vtanh.f32 %v2968_v35  ;;  %v3290_v47 = vrot.slane %v2968_v35, 6  ;;  %v3801_v35 = vld [vmem:[#allocation8 + $0x98] sm:$0xff] }
 0xad8   :  { %v5095_v33 = vpop.eup %5094 }
 0xad9   :  { %v2976_v42 = vmul.f32 %v5095_v33, %v5093_v41  ;;  %v4902_v41 = vpack.c.bf16 %v3801_v35, %v3800_v39  ;;  %v3802_v33 = vld [vmem:[#allocation8 + $0xa0] sm:$0xff]  ;;  %v3897_v39 = vld [vmem:[#allocation8 + $0x110] sm:$0xff]  ;;  %v3898_v35 = vld [vmem:[#allocation8 + $0x118] sm:$0xff] }
 0xadb   :  { %v2978_v43 = vrot.slane %v2976_v42, 2  ;;  %v3803_v42 = vld [vmem:[#allocation8 + $0xa8] sm:$0xff] }
 0xadd   :  { %4606 = vmatmul.mubr.msk.f32.vlgmr.msra.gmra.mrb[26].mxu1 %vm114_vm0, %v2978_v43  ;;  %4613 = vmatmul.mubr.msk.f32.vlgmr.msra.gmra.mrb[40].mxu0 %vm114_vm0, %v2978_v43 }
 0xade   :  { %4876 = vmatpush3.bf16.msra.mxu1 %v5459_v11  ;;  %4879 = vmatpush3.bf16.msra.mxu0 %v5484_v22 }
 0xadf   :  { %4619 = vmatprep.mubr.msk.f32.mxu1 %vm5260_vm2, %v5261_v7  ;;  %4626 = vmatprep.mubr.msk.f32.mxu0 %vm5260_vm2, %v5261_v7 }
 0xae0   :  { %4880 = vmatprep.subr.bf16.mxu1 %v5259_v5  ;;  %4883 = vmatprep.subr.bf16.mxu0 %v5259_v5 }
 0xae1   :  { %4620 = vmatmul.mubr.msk.f32.vlgmr.msra.gmra.mrb[28].mxu1 %vm114_vm0, %v2978_v43  ;;  %4627 = vmatmul.mubr.msk.f32.vlgmr.msra.gmra.mrb[42].mxu0 %vm114_vm0, %v2978_v43  ;;  %v4905_v43 = vpack.c.bf16 %v3803_v42, %v3802_v33  ;;  %v3899_v33 = vld [vmem:[#allocation8 + $0x120] sm:$0xff]  ;;  %v3900_v42 = vld [vmem:[#allocation8 + $0x128] sm:$0xff] }
 0xae2   :  { %4882 = vmatpush3.bf16.msra.mxu1 %v5452_v3  ;;  %4885 = vmatpush3.bf16.msra.mxu0 %v5477_v20 }
 0xae3   :  { %4633 = vmatprep.mubr.msk.f32.mxu1 %vm5260_vm2, %v5261_v7  ;;  %4640 = vmatprep.mubr.msk.f32.mxu0 %vm5260_vm2, %v5261_v7 }
 0xae4   :  { %4886 = vmatprep.subr.bf16.mxu1 %v5259_v5  ;;  %4889 = vmatprep.subr.bf16.mxu0 %v5259_v5 }
 0xbb0   :  { %v3047_v45 = vpop.f32.mrb[26].mxu1  ;;  %v3121_v46 = vpop.f32.mrb[40].mxu0 }
 0xbb1   :  { %v3052_v48 = vrot.slane %v3047_v45, 4  ;;  %v3126_v49 = vrot.slane %v3121_v46, 4  ;;  %v4607_v50 = vpop.f32.mrb[27].mxu1  ;;  %v4614_v51 = vpop.f32.mrb[41].mxu0 }
 0xbb3   :  { %v3054_v3 = vadd.f32 %v3052_v48, %v5512_v44  ;;  %v3128_v20 = vadd.f32 %v3126_v49, %v5518_v55 }
 0xbb4   :  { %v3195_v52 = vpop.f32.mrb[28].mxu1  ;;  %v3269_v53 = vpop.f32.mrb[42].mxu0 }
 0xbb5   :  { %v4177_v54 = vmul.f32 -1.442695, %v3054_v3  ;;  %v4178_v56 = vmul.f32 -1.442695, %v3128_v20  ;;  %v3274_v57 = vrot.slane %v3269_v53, 4  ;;  %v4621_v58 = vpop.f32.mrb[29].mxu1 }
 0xbb6   :  { %v4628_v59 = vpop.f32.mrb[43].mxu0  ;;  %v3200_v62 = vrot.slane %v3195_v52, 4 }
 0xbb7   :  { %5096 = vpow2.f32 %v4177_v54  ;;  %v3276_v61 = vadd.f32 %v3274_v57, %v5520_v0 }
 0xbb8   :  { %5098 = vpow2.f32 %v4178_v56  ;;  %v3202_v60 = vadd.f32 %v3200_v62, %v5497_v28 }
 0xbb9   :  { %v4179_v63 = vmul.f32 -1.442695, %v3276_v61 }
 0xbbb   :  { %5100 = vpow2.f32 %v4179_v63 }
 0xbbc   :  { %5102 = vtanh.f32 %v3202_v60 }
 0xbc1   :  { %v5097_v1 = vpop.eup %5096 }
 0xbc2   :  { %v5099_v2 = vpop.eup %5098  ;;  %v3280_v8 = vadd.f32 1.0, %v5097_v1 }
 0xbc3   :  { %v3286_v13 = vadd.f32 1.0, %v5099_v2 }
 0xbc4   :  { %5104 = vrcp.f32 %v3280_v8 }
 0xbc5   :  { %5106 = vrcp.f32 %v3286_v13  ;;  %v5101_v14 = vpop.eup %5100 }
 0xbc6   :  { %v5103_v15 = vpop.eup %5102  ;;  %v3299_v18 = vadd.f32 1.0, %v5101_v14 }
 0xbc8   :  { %5108 = vrcp.f32 %v3299_v18 }
 0xbce   :  { %v5105_v16 = vpop.eup %5104 }
 0xbcf   :  { %v5107_v9 = vpop.eup %5106  ;;  %v3294_v17 = vmul.f32 %v5105_v16, %v5103_v15 }
 0xbd0   :  { %v3292_v19 = vmul.f32 %v5107_v9, %v3290_v47 }
 0xbd2   :  { %v5688_v21 = vadd.f32 %v3294_v17, %v3292_v19  ;;  %v5109_v32 = vpop.eup %5108 }
 0xbd4   :  { %5110 = vtanh.f32 %v5688_v21  ;;  %v3617_v47 = vrot.slane %v5688_v21, 6  ;;  %v3806_v21 = vld [vmem:[#allocation8 + $0xc0] sm:$0xff] }
 0xbde   :  { %v5111_v12 = vpop.eup %5110 }
 0xbdf   :  { %v3303_v26 = vmul.f32 %v5111_v12, %v5109_v32  ;;  %v3804_v32 = vld [vmem:[#allocation8 + $0xb0] sm:$0xff] }
 0xbe0   :  { %v4908_v12 = vpack.c.bf16 %v3805_v25, %v3804_v32 }
 0xbe1   :  { %v3305_v30 = vrot.slane %v3303_v26, 4  ;;  %v3807_v26 = vld [vmem:[#allocation8 + $0xc8] sm:$0xff] }
 0xbe3   :  { %4634 = vmatmul.mubr.msk.f32.vlgmr.msra.gmra.mrb[30].mxu1 %vm114_vm0, %v3305_v30  ;;  %4641 = vmatmul.mubr.msk.f32.vlgmr.msra.gmra.mrb[44].mxu0 %vm114_vm0, %v3305_v30 }
 0xbe4   :  { %4888 = vmatpush3.bf16.msra.mxu1 %v5459_v11  ;;  %4891 = vmatpush3.bf16.msra.mxu0 %v5484_v22  ;;  %v697_v11 = vmul.f32 0.0625, %v696_v4  ;;  %v3633_v22 = vld [vmem:[#allocation8 + $0x10] sm:$0xff]  ;;  %v3811_v4 = vld [vmem:[#allocation8 + $0xe8] sm:$0xff] }
 0xbe5   :  { %4647 = vmatprep.mubr.msk.f32.mxu1 %vm5260_vm2, %v5261_v7  ;;  %4654 = vmatprep.mubr.msk.f32.mxu0 %vm5260_vm2, %v5261_v7  ;;  %v4896_v37 = vpack.c.bf16 %v3634_v36, %v3633_v22  ;;  %v3812_v22 = vld [vmem:[#allocation8 + $0xf0] sm:$0xff]  ;;  %v3813_v36 = vld [vmem:[#allocation8 + $0xf8] sm:$0xff] }
 0xbe6   :  { %4892 = vmatprep.subr.bf16.mxu1 %v5259_v5  ;;  %4895 = vmatprep.subr.bf16.mxu0 %v5259_v5 }
 0xbe7   :  { %4648 = vmatmul.mubr.msk.f32.vlgmr.msra.gmra.mrb[32].mxu1 %vm114_vm0, %v3305_v30  ;;  %4655 = vmatmul.mubr.msk.f32.vlgmr.msra.gmra.mrb[46].mxu0 %vm114_vm0, %v3305_v30  ;;  %v4911_v30 = vpack.c.bf16 %v3807_v26, %v3806_v21 }
 0xbe8   :  { %4894 = vmatpush3.bf16.msra.mxu1 %v4893_v34  ;;  %4661 = vmatprep.mubr.msk.f32.mxu1 %vm5260_vm2, %v5261_v7  ;;  %v3810_v34 = vld [vmem:[#allocation8 + $0xe0] sm:$0xff] }
 0xbe9   :  { %4668 = vmatprep.mubr.msk.f32.mxu0 %vm5260_vm2, %v5261_v7  ;;  %4898 = vmatprep.subr.bf16.mxu1 %v5259_v5 }
 0xbea   :  { %4897 = vmatpush3.bf16.msra.mxu0 %v4896_v37  ;;  %v4920_v37 = vpack.c.bf16 %v3813_v36, %v3812_v22  ;;  %v4001_v22 = vld [vmem:[#allocation8 + $0x1c8] sm:$0xff] }
 0xbeb   :  { %4662 = vmatmul.mubr.msk.f32.vlgmr.msra.gmra.mrb[34].mxu1 %vm114_vm0, %v697_v11  ;;  %4922 = vmatprep.subr.bf16.mxu0 %v5259_v5  ;;  %v4917_v11 = vpack.c.bf16 %v3811_v4, %v3810_v34  ;;  %v3999_v34 = vld [vmem:[#allocation8 + $0x1b8] sm:$0xff] }
 0xbec   :  { %4703 = vmatprep.mubr.msk.f32.mxu1 %vm5260_vm2, %v5261_v7  ;;  %4900 = vmatpush3.bf16.msra.mxu1 %v4899_v40  ;;  %v4923_v40 = vpack.c.bf16 %v3896_v29, %v3895_v38  ;;  %v4003_v38 = vld [vmem:[#allocation8 + $0x1d8] sm:$0xff] }
 0xbed   :  { %4901 = vmatprep.subr.bf16.mxu1 %v5259_v5 }
 0xbf0   :  { %4903 = vmatpush3.bf16.msra.mxu1 %v4902_v41  ;;  %v4926_v41 = vpack.c.bf16 %v3898_v35, %v3897_v39  ;;  %v4004_v39 = vld [vmem:[#allocation8 + $0x1e0] sm:$0xff] }
 0xbf1   :  { %4904 = vmatprep.subr.bf16.mxu1 %v5259_v5 }
 0xbf4   :  { %4906 = vmatpush3.bf16.msra.mxu1 %v4905_v43  ;;  %v4929_v43 = vpack.c.bf16 %v3900_v42, %v3899_v33  ;;  %v4007_v33 = vld [vmem:[#allocation8 + $0x1f8] sm:$0xff] }
 0xbf5   :  { %4907 = vmatprep.subr.bf16.mxu1 %v5259_v5 }
 0xbf8   :  { %4909 = vmatpush3.bf16.msra.mxu1 %v4908_v12 }
 0xbf9   :  { %4910 = vmatprep.subr.bf16.mxu1 %v5259_v5 }
 0xbfc   :  { %4912 = vmatpush3.bf16.msra.mxu1 %v4911_v30 }
 0xbfd   :  { %4913 = vmatprep.subr.bf16.mxu1 %v5259_v5 }
 0xc00   :  { %4915 = vmatpush3.bf16.msra.mxu1 %v4914_v27  ;;  %v3998_v27 = vld [vmem:[#allocation8 + $0x1b0] sm:$0xff] }
 0xc01   :  { %4916 = vmatprep.subr.bf16.mxu1 %v5259_v5  ;;  %v4956_v4 = vpack.c.bf16 %v3999_v34, %v3998_v27 }
 0xc04   :  { %4918 = vmatpush3.bf16.msra.mxu1 %v4917_v11  ;;  %v4000_v11 = vld [vmem:[#allocation8 + $0x1c0] sm:$0xff] }
 0xc05   :  { %4919 = vmatprep.subr.bf16.mxu1 %v5259_v5  ;;  %v4959_v36 = vpack.c.bf16 %v4001_v22, %v4000_v11 }
 0xc08   :  { %4921 = vmatpush3.bf16.msra.mxu1 %v4920_v37  ;;  %v4002_v37 = vld [vmem:[#allocation8 + $0x1d0] sm:$0xff] }
 0xc09   :  { %4946 = vmatprep.subr.bf16.mxu1 %v5259_v5  ;;  %v4962_v29 = vpack.c.bf16 %v4003_v38, %v4002_v37 }
 0xcb6   :  { %v3374_v45 = vpop.f32.mrb[30].mxu1  ;;  %v3448_v46 = vpop.f32.mrb[44].mxu0 }
 0xcb7   :  { %v3379_v48 = vrot.slane %v3374_v45, 2  ;;  %v3453_v49 = vrot.slane %v3448_v46, 2  ;;  %v4635_v50 = vpop.f32.mrb[31].mxu1  ;;  %v4642_v51 = vpop.f32.mrb[45].mxu0  ;;  %v3708_v45 = vlaneseq }
 0xcb8   :  { %v4189_v51 = vld [vmem:[%s5780_s8] ss:$0 sm:$0xff] }
 0xcb9   :  { %v3381_v3 = vadd.f32 %v3379_v48, %v5512_v44  ;;  %v3455_v20 = vadd.f32 %v3453_v49, %v5518_v55  ;;  %v3709_v46 = vshrl.u32 %v3708_v45, 7 }
 0xcba   :  { %v3522_v52 = vpop.f32.mrb[32].mxu1  ;;  %v3596_v53 = vpop.f32.mrb[46].mxu0 }
 0xcbb   :  { %v4184_v54 = vmul.f32 -1.442695, %v3381_v3  ;;  %v4185_v56 = vmul.f32 -1.442695, %v3455_v20  ;;  %v3601_v57 = vrot.slane %v3596_v53, 2  ;;  %v4649_v58 = vpop.f32.mrb[33].mxu1 }
 0xcbc   :  { %v4656_v59 = vpop.f32.mrb[47].mxu0  ;;  %v3527_v60 = vrot.slane %v3522_v52, 2  ;;  %v3710_v48 = vsub.s32 0, %v3709_v46 }
 0xcbd   :  { %5112 = vpow2.f32 %v4184_v54  ;;  %v3603_v63 = vadd.f32 %v3601_v57, %v5520_v0  ;;  %v3901_v59 = vld [vmem:[#allocation8 + $0x130] sm:$0xff] }
 0xcbe   :  { %5114 = vpow2.f32 %v4185_v56  ;;  %v5718_v61 = vpop.f32.mrb[34].mxu1  ;;  %v3529_v44 = vadd.f32 %v3527_v60, %v5497_v28  ;;  %v3904_v60 = vld [vmem:[#allocation8 + $0x148] sm:$0xff] }
 0xcbf   :  { %v4663_v62 = vpop.f32.mrb[35].mxu1  ;;  %v4186_v1 = vmul.f32 -1.442695, %v3603_v63  ;;  %v3711_v49 = vrot.slane %v5718_v61, %v3710_v48  ;;  %v3902_v61 = vld [vmem:[#allocation8 + $0x138] sm:$0xff]  ;;  %v3903_v63 = vld [vmem:[#allocation8 + $0x140] sm:$0xff] }
 0xcc0   :  { %v4932_v62 = vpack.c.bf16 %v3902_v61, %v3901_v59 }
 0xcc1   :  { %5116 = vpow2.f32 %v4186_v1  ;;  %v4935_v1 = vpack.c.bf16 %v3904_v60, %v3903_v63 }
 0xcc2   :  { %5118 = vtanh.f32 %v3529_v44  ;;  %v3905_v44 = vld [vmem:[#allocation8 + $0x150] sm:$0xff] }
 0xcc7   :  { %v5113_v2 = vpop.eup %5112 }
 0xcc8   :  { %v5115_v55 = vpop.eup %5114  ;;  %v3607_v8 = vadd.f32 1.0, %v5113_v2  ;;  %v3906_v2 = vld [vmem:[#allocation8 + $0x158] sm:$0xff] }
 0xcc9   :  { %v3613_v13 = vadd.f32 1.0, %v5115_v55  ;;  %v4938_v55 = vpack.c.bf16 %v3906_v2, %v3905_v44 }
 0xcca   :  { %5120 = vrcp.f32 %v3607_v8  ;;  %v3907_v8 = vld [vmem:[#allocation8 + $0x160] sm:$0xff] }
 0xccb   :  { %5122 = vrcp.f32 %v3613_v13  ;;  %v5117_v14 = vpop.eup %5116 }
 0xccc   :  { %v5119_v15 = vpop.eup %5118  ;;  %v3626_v0 = vadd.f32 1.0, %v5117_v14  ;;  %v3909_v14 = vld [vmem:[#allocation8 + $0x170] sm:$0xff] }
 0xcce   :  { %5124 = vrcp.f32 %v3626_v0 }
 0xcd4   :  { %v5121_v16 = vpop.eup %5120 }
 0xcd5   :  { %v5123_v9 = vpop.eup %5122  ;;  %v3621_v17 = vmul.f32 %v5121_v16, %v5119_v15  ;;  %v3910_v15 = vld [vmem:[#allocation8 + $0x178] sm:$0xff] }
 0xcd6   :  { %v3619_v18 = vmul.f32 %v5123_v9, %v3617_v47  ;;  %v4944_v16 = vpack.c.bf16 %v3910_v15, %v3909_v14  ;;  %v3992_v47 = vld [vmem:[#allocation8 + $0x180] sm:$0xff]  ;;  %v3993_v9 = vld [vmem:[#allocation8 + $0x188] sm:$0xff] }
 0xcd7   :  { %v4947_v0 = vpack.c.bf16 %v3993_v9, %v3992_v47 }
 0xcd8   :  { %v3622_v19 = vadd.f32 %v3621_v17, %v3619_v18  ;;  %v5125_v28 = vpop.eup %5124  ;;  %v3994_v17 = vld [vmem:[#allocation8 + $0x190] sm:$0xff]  ;;  %v3995_v18 = vld [vmem:[#allocation8 + $0x198] sm:$0xff] }
 0xcda   :  { %5126 = vtanh.f32 %v3622_v19  ;;  %v4950_v19 = vpack.c.bf16 %v3995_v18, %v3994_v17 }
 0xce4   :  { %v5127_v10 = vpop.eup %5126 }
 0xce5   :  { %v3630_v6 = vmul.f32 %v5127_v10, %v5125_v28  ;;  %v3996_v28 = vld [vmem:[#allocation8 + $0x1a0] sm:$0xff]  ;;  %v3997_v10 = vld [vmem:[#allocation8 + $0x1a8] sm:$0xff] }
 0xce7   :  { %v3713_v23 = vrot.slane %v3630_v6, 6  ;;  %v4953_v6 = vpack.c.bf16 %v3997_v10, %v3996_v28 }
 0xce9   :  { %4669 = vmatmul.mubr.msk.f32.vlgmr.msra.gmra.mrb[48].mxu0 %vm114_vm0, %v3713_v23  ;;  %v4190_v23 = vld [vmem:[%s5780_s8 + $0x1] ss:$0 sm:$0xff] }
 0xcea   :  { %4738 = vmatprep.mubr.msk.f32.mxu0 %vm5260_vm2, %v5261_v7  ;;  %4924 = vmatpush3.bf16.msra.mxu0 %v4923_v40  ;;  %v4005_v40 = vld [vmem:[#allocation8 + $0x1e8] sm:$0xff] }
 0xceb   :  { %4925 = vmatprep.subr.bf16.mxu0 %v5259_v5  ;;  %v4965_v35 = vpack.c.bf16 %v4005_v40, %v4004_v39 }
 0xcee   :  { %4927 = vmatpush3.bf16.msra.mxu0 %v4926_v41  ;;  %v4006_v41 = vld [vmem:[#allocation8 + $0x1f0] sm:$0xff] }
 0xcef   :  { %4928 = vmatprep.subr.bf16.mxu0 %v5259_v5  ;;  %v4968_v42 = vpack.c.bf16 %v4007_v33, %v4006_v41 }
 0xcf2   :  { %4930 = vmatpush3.bf16.msra.mxu0 %v4929_v43  ;;  %v4191_v43 = vld [vmem:[%s5780_s8 + $0x2] ss:$0 sm:$0xff] }
 0xcf3   :  { %4931 = vmatprep.subr.bf16.mxu0 %v5259_v5 }
 0xcf6   :  { %4933 = vmatpush3.bf16.msra.mxu0 %v4932_v62 }
 0xcf7   :  { %4934 = vmatprep.subr.bf16.mxu0 %v5259_v5 }
 0xcfa   :  { %4936 = vmatpush3.bf16.msra.mxu0 %v4935_v1 }
 0xcfb   :  { %4937 = vmatprep.subr.bf16.mxu0 %v5259_v5 }
 0xcfe   :  { %4939 = vmatpush3.bf16.msra.mxu0 %v4938_v55 }
 0xcff   :  { %4940 = vmatprep.subr.bf16.mxu0 %v5259_v5 }
 0xdbc   :  { %v3782_v50 = vpop.f32.mrb[48].mxu0 }
 0xdbd   :  { %v3783_v3 = vadd.f32 %v3782_v50, %v3711_v49  ;;  %v4670_v20 = vpop.f32.mrb[49].mxu0 }
 0xdbf   :  { %v3791_v52 = vadd.f32 %v4189_v51, %v3783_v3 }
 0xdc1   :  { %v3793_v53 = vmul.f32 0.70710677, %v3791_v52  ;;  %v3792_v56 = vmul.f32 0.5, %v3791_v52 }
 0xdc3   :  { %5128 = verf.f32 %v3793_v53 }
 0xdcd   :  { %v5129_v54 = vpop.eup %5128 }
 0xdce   :  { %v3795_v57 = vadd.f32 1.0, %v5129_v54 }
 0xdd0   :  { %v3796_v58 = vmul.f32 %v3795_v57, %v3792_v56 }
 0xdd2   :  { %4704 = vmatmul.mubr.f32.vlgmr.msra.gmra.mrb[36].mxu1 %v3796_v58 }
 0xdd3   :  { %4773 = vmatprep.mubr.msk.f32.mxu1 %vm5260_vm2, %v5261_v7  ;;  %v3908_v7 = vld [vmem:[#allocation8 + $0x168] sm:$0xff]  ;;  %4948 = vmatpush3.bf16.msra.mxu1 %v4947_v0 }
 0xdd4   :  { %v4941_v13 = vpack.c.bf16 %v3908_v7, %v3907_v8  ;;  %4949 = vmatprep.subr.bf16.mxu1 %v5259_v5 }
 0xdd6   :  { %4942 = vmatpush3.bf16.msra.mxu0 %v4941_v13 }
 0xdd7   :  { %4943 = vmatprep.subr.bf16.mxu0 %v5259_v5  ;;  %4951 = vmatpush3.bf16.msra.mxu1 %v4950_v19 }
 0xdd8   :  { %4952 = vmatprep.subr.bf16.mxu1 %v5259_v5 }
 0xdda   :  { %4945 = vmatpush3.bf16.msra.mxu0 %v4944_v16 }
 0xddb   :  { %4954 = vmatpush3.bf16.msra.mxu1 %v4953_v6 }
 0xddc   :  { %4955 = vmatprep.subr.bf16.mxu1 %v5259_v5 }
 0xddf   :  { %4957 = vmatpush3.bf16.msra.mxu1 %v4956_v4 }
 0xde0   :  { %4958 = vmatprep.subr.bf16.mxu1 %v5259_v5 }
 0xde3   :  { %4960 = vmatpush3.bf16.msra.mxu1 %v4959_v36 }
 0xde4   :  { %4961 = vmatprep.subr.bf16.mxu1 %v5259_v5 }
 0xde7   :  { %4963 = vmatpush3.bf16.msra.mxu1 %v4962_v29 }
 0xde8   :  { %4964 = vmatprep.subr.bf16.mxu1 %v5259_v5 }
 0xdeb   :  { %4966 = vmatpush3.bf16.msra.mxu1 %v4965_v35 }
 0xdec   :  { %4967 = vmatprep.subr.bf16.mxu1 %v5259_v5  ;;  %v4192_v5 = vld [vmem:[%s5780_s8 + $0x3] ss:$0 sm:$0xff] }
 0xdef   :  { %4969 = vmatpush3.bf16.msra.mxu1 %v4968_v42 }
 0xea5   :  { %v3885_v32 = vpop.f32.mrb[36].mxu1 }
 0xea6   :  { %v3886_v25 = vadd.f32 %v4190_v23, %v3885_v32  ;;  %v4705_v12 = vpop.f32.mrb[37].mxu1 }
 0xea8   :  { %v3890_v21 = vmul.f32 0.70710677, %v3886_v25  ;;  %v3889_v30 = vmul.f32 0.5, %v3886_v25 }
 0xeaa   :  { %5130 = verf.f32 %v3890_v21 }
 0xeb4   :  { %v5131_v26 = vpop.eup %5130 }
 0xeb5   :  { %v3892_v31 = vadd.f32 1.0, %v5131_v26 }
 0xeb7   :  { %v3893_v24 = vmul.f32 %v3892_v31, %v3889_v30 }
 0xeb9   :  { %4739 = vmatmul.mubr.f32.vlgmr.msra.gmra.mrb[50].mxu0 %v3893_v24 }
 0xf8c   :  { %v3982_v45 = vpop.f32.mrb[50].mxu0 }
 0xf8d   :  { %v3983_v46 = vadd.f32 %v4191_v43, %v3982_v45  ;;  %v4740_v48 = vpop.f32.mrb[51].mxu0 }
 0xf8f   :  { %v3987_v49 = vmul.f32 0.70710677, %v3983_v46  ;;  %v3986_v51 = vmul.f32 0.5, %v3983_v46 }
 0xf91   :  { %5132 = verf.f32 %v3987_v49 }
 0xf9b   :  { %v5133_v50 = vpop.eup %5132 }
 0xf9c   :  { %v3989_v3 = vadd.f32 1.0, %v5133_v50 }
 0xf9e   :  { %v3990_v20 = vmul.f32 %v3989_v3, %v3986_v51 }
 0xfa0   :  { %4774 = vmatmul.mubr.f32.vlgmr.msra.gmra.mrb[38].mxu1 %v3990_v20 }
0x1073   :  { %v4079_v52 = vpop.f32.mrb[38].mxu1 }
0x1074   :  { %v4080_v53 = vadd.f32 %v4192_v5, %v4079_v52  ;;  %v4775_v54 = vpop.f32.mrb[39].mxu1 }
0x1076   :  { %4083 = vst [vmem:[#allocation10] sm:$0x3] %v4080_v53 }
0x1077   :  { %5233 = shalt.err (!%p5230_p8)
}
0x1078   :  { %s5234_s23 = scalar_lea.hbm %s5781_s9, 32 }
0x1079   :  { %p5235_p9 = scmp.ne.s32.totalorder %s5781_s9, %s5234_s23  ;;  %p5238_p10 = scmp.lt.u32.totalorder %s5234_s23, %s5781_s9 }
0x107b   :  { %p5240_p11 = pnand %p5238_p10, %p5235_p9 }
0x107d   :  { %5243 = shalt.err (!%p5240_p11)
}
0x107e   :  { %4093 = dma.vmem_to_hbm [thread:$0]  %s4091_s16, 32, %s5781_s9, [#allocation4]  }
0x107f   :  { %5250 = dma.done.wait [#allocation4], 32  }
0x1080   :  { %5251 = vsyncadd [#allocation4], 4294967264 }
0x1081   :  { %4097 = vsyncpa [#allocation3], 1 }
0x1082   :  { %4098 = vsyncpa [#allocation6], 1 }
0x1083   :  { %4099 = vsyncpa [#allocation9], 1 }
0x1084   :  { %4100 = vsyncpa [#allocation4], 1 }

</bundles_post_ra>
